<compile_context>
chip_gen: v7x
topology: tpu7x:2x2x1
jax: 0.10.0
libtpu: 0.0.40
codegen_flags: <defaults>
</compile_context>

<pallas_src>
import functools

import jax
import jax.numpy as jnp
import numpy as np
from jax import lax
from jax.experimental import pallas as pl
from jax.experimental.pallas import tpu as pltpu


def _make_gcnn_kernel(T, kgnn, dt):
    """Builds the single-invocation GCNN recurrence kernel."""

    def kernel(x0_ref, sblk_ref, h1_ref, h2_ref, xout_ref, uout_ref):
        Sb = sblk_ref[...]          # (B*N, B*N) block-diagonal kron(I_B, S)
        H1c = h1_ref[...]           # ((kgnn+1)*p, fgnn) stacked filter taps
        H2m = h2_ref[...]           # (fgnn, p)

        def body(t, X):             # X: (B*N, p) current state
            # Horner hops: Y_0 = X (S^0 = I hop is free), Y_i = S @ Y_{i-1}.
            ys = [X]
            for _ in range(kgnn):
                ys.append(jnp.dot(Sb, ys[-1],
                                  preferred_element_type=jnp.float32))
            ycat = jnp.concatenate(ys, axis=-1)      # (B*N, (kgnn+1)*p)

            # Z = tanh( sum_i S^i X H1[i] )  — one stacked matmul.
            z = jnp.tanh(jnp.dot(ycat, H1c,
                                 preferred_element_type=jnp.float32))

            # U = S Z H2
            sz = jnp.dot(Sb, z, preferred_element_type=jnp.float32)
            u = jnp.dot(sz, H2m, preferred_element_type=jnp.float32)  # (B*N, p)

            # Baked-in linear step x_{t+1} = x_t + dt * u_t.
            xn = X + dt * u

            xout_ref[t] = xn
            uout_ref[t] = u
            return xn

        lax.fori_loop(0, T, body, x0_ref[...], unroll=(T <= 16))

    return kernel


@functools.partial(jax.jit, static_argnames=("T", "dt"))
def gcnn_forward(x0, S, H1, H2, *, T, dt=0.1):
    """Runs the GCNN recurrence for T steps.

    Returns (x_traj, u_traj) with PyTorch shapes:
      x_traj: (B, T+1, N, p),  u_traj: (B, T, N, p)   (q == p)
    """
    B, N, p = x0.shape
    K1, _, fgnn = H1.shape
    kgnn = K1 - 1
    BN = B * N

    # ---- glue: fold batch into a block-diagonal S, stack H1 taps (done once) ----
    x0f = x0.astype(jnp.float32).reshape(BN, p)                       # rows = (b, n)
    Sblk = jnp.kron(jnp.eye(B, dtype=jnp.float32), S.astype(jnp.float32))  # (BN, BN)
    H1cat = H1.astype(jnp.float32).reshape(K1 * p, fgnn)              # ((k+1)*p, fgnn)
    H2m = H2.astype(jnp.float32)[0]                                   # (fgnn, p)

    kernel = _make_gcnn_kernel(T=T, kgnn=kgnn, dt=float(dt))

    x_steps, u_steps = pl.pallas_call(
        kernel,
        out_shape=(
            jax.ShapeDtypeStruct((T, BN, p), jnp.float32),   # x_{t+1}, t=0..T-1
            jax.ShapeDtypeStruct((T, BN, p), jnp.float32),   # u_t,     t=0..T-1
        ),
        in_specs=[pl.BlockSpec(memory_space=pltpu.MemorySpace.VMEM)] * 4,
        out_specs=(pl.BlockSpec(memory_space=pltpu.MemorySpace.VMEM),
                   pl.BlockSpec(memory_space=pltpu.MemorySpace.VMEM)),
    )(x0f, Sblk, H1cat, H2m)

    # ---- assemble PyTorch-shaped trajectories ----
    x_steps = x_steps.reshape(T, B, N, p).transpose(1, 0, 2, 3)   # (B, T, N, p)
    u_steps = u_steps.reshape(T, B, N, p).transpose(1, 0, 2, 3)   # (B, T, N, p)
    x_traj = jnp.concatenate(
        [x0.astype(jnp.float32)[:, None], x_steps], axis=1)       # (B, T+1, N, p)
    return x_traj, u_steps


def gcnn_forward_ref(x0, S, H1, H2, *, T, dt=0.1):
    """Pure-JAX reference mirroring the PyTorch forward (step = x + dt*u)."""
    kgnn = H1.shape[0] - 1
    xs = [x0]
    us = []
    xt = x0
    for _ in range(T):
        Z = jnp.einsum("bnp,pf->bnf", xt, H1[0])
        Sp = S
        for i in range(1, kgnn + 1):
            SX = jnp.einsum("nm,bmp->bnp", Sp, xt)
            Z = Z + jnp.einsum("bnp,pf->bnf", SX, H1[i])
            Sp = Sp @ S
        Z = jnp.tanh(Z)
        U = jnp.einsum("nm,bmf->bnf", S, Z)
        U = jnp.einsum("bnf,fp->bnp", U, H2[0])
        xt = xt + dt * U
        xs.append(xt)
        us.append(U)
    return jnp.stack(xs, axis=1), jnp.stack(us, axis=1)


if __name__ == "__main__":
    # Small deterministic problem: N=8 agents, p=q=4, fgnn=32, kgnn=3, T=8, batch=2.
    B, N, p, fgnn, kgnn, T = 2, 8, 4, 32, 3, 8
    key = jax.random.PRNGKey(0)
    k1, k2, k3, k4 = jax.random.split(key, 4)

    # Deterministic row-normalized communication topology S.
    A = (jax.random.uniform(k1, (N, N)) > 0.5).astype(jnp.float32)
    A = A + jnp.eye(N, dtype=jnp.float32)
    S = A / jnp.sum(A, axis=1, keepdims=True)

    H1 = jax.random.normal(k2, (kgnn + 1, p, fgnn), dtype=jnp.float32) * 0.1
    H2 = jax.random.normal(k3, (1, fgnn, p), dtype=jnp.float32) * 0.1
    x0 = jax.random.normal(k4, (B, N, p), dtype=jnp.float32)

    x_traj, u_traj = gcnn_forward(x0, S, H1, H2, T=T, dt=0.1)
    jax.block_until_ready((x_traj, u_traj))

    x_ref, u_ref = gcnn_forward_ref(x0, S, H1, H2, T=T, dt=0.1)
    assert x_traj.shape == (B, T + 1, N, p) and u_traj.shape == (B, T, N, p)
    np.testing.assert_allclose(np.asarray(x_traj), np.asarray(x_ref),
                               rtol=1e-4, atol=1e-4)
    np.testing.assert_allclose(np.asarray(u_traj), np.asarray(u_ref),
                               rtol=1e-4, atol=1e-4)
    print("KERNEL_OK")
</pallas_src>

<mosaic_0001>
module attributes {stable_mosaic.version = 11 : i64} {
  func.func @kernel(%arg0: memref<16x4xf32, #tpu.memory_space<vmem>>, %arg1: memref<16x16xf32, #tpu.memory_space<vmem>>, %arg2: memref<16x32xf32, #tpu.memory_space<vmem>>, %arg3: memref<32x4xf32, #tpu.memory_space<vmem>>, %arg4: memref<8x16x4xf32, #tpu.memory_space<vmem>>, %arg5: memref<8x16x4xf32, #tpu.memory_space<vmem>>) attributes {dimension_semantics = [], scalar_prefetch = 0 : i64, scratch_operands = 0 : i64, tpu.core_type = #tpu.core_type<tc>} {
    %c0 = arith.constant 0 : index
    %c0_0 = arith.constant 0 : index
    %0 = vector.load %arg1[%c0, %c0_0] : memref<16x16xf32, #tpu.memory_space<vmem>>, vector<16x16xf32>
    %c0_1 = arith.constant 0 : index
    %c0_2 = arith.constant 0 : index
    %1 = vector.load %arg2[%c0_1, %c0_2] : memref<16x32xf32, #tpu.memory_space<vmem>>, vector<16x32xf32>
    %c0_3 = arith.constant 0 : index
    %c0_4 = arith.constant 0 : index
    %2 = vector.load %arg3[%c0_3, %c0_4] : memref<32x4xf32, #tpu.memory_space<vmem>>, vector<32x4xf32>
    %c0_5 = arith.constant 0 : index
    %c0_6 = arith.constant 0 : index
    %3 = vector.load %arg0[%c0_5, %c0_6] : memref<16x4xf32, #tpu.memory_space<vmem>>, vector<16x4xf32>
    %c0_i32 = arith.constant 0 : i32
    %cst = arith.constant dense<0.000000e+00> : vector<16x4xf32>
    %4 = tpu.matmul %0, %3, %cst {dimension_numbers = #tpu.dot_dimension_numbers<[1], [0], [0], [1], [0, 0, 1, 1], [], []>} : vector<16x16xf32>, vector<16x4xf32>, vector<16x4xf32> -> vector<16x4xf32>
    %cst_7 = arith.constant dense<0.000000e+00> : vector<16x4xf32>
    %5 = tpu.matmul %0, %4, %cst_7 {dimension_numbers = #tpu.dot_dimension_numbers<[1], [0], [0], [1], [0, 0, 1, 1], [], []>} : vector<16x16xf32>, vector<16x4xf32>, vector<16x4xf32> -> vector<16x4xf32>
    %cst_8 = arith.constant dense<0.000000e+00> : vector<16x4xf32>
    %6 = tpu.matmul %0, %5, %cst_8 {dimension_numbers = #tpu.dot_dimension_numbers<[1], [0], [0], [1], [0, 0, 1, 1], [], []>} : vector<16x16xf32>, vector<16x4xf32>, vector<16x4xf32> -> vector<16x4xf32>
    %7 = tpu.concatenate %3, %4, %5, %6 in 1 : vector<16x4xf32>, vector<16x4xf32>, vector<16x4xf32>, vector<16x4xf32> -> vector<16x16xf32>
    %cst_9 = arith.constant dense<0.000000e+00> : vector<16x32xf32>
    %8 = tpu.matmul %7, %1, %cst_9 {dimension_numbers = #tpu.dot_dimension_numbers<[1], [0], [0], [1], [0, 0, 1, 1], [], []>} : vector<16x16xf32>, vector<16x32xf32>, vector<16x32xf32> -> vector<16x32xf32>
    %9 = math.tanh %8 : vector<16x32xf32>
    %cst_10 = arith.constant dense<0.000000e+00> : vector<16x32xf32>
    %10 = tpu.matmul %0, %9, %cst_10 {dimension_numbers = #tpu.dot_dimension_numbers<[1], [0], [0], [1], [0, 0, 1, 1], [], []>} : vector<16x16xf32>, vector<16x32xf32>, vector<16x32xf32> -> vector<16x32xf32>
    %cst_11 = arith.constant dense<0.000000e+00> : vector<16x4xf32>
    %11 = tpu.matmul %10, %2, %cst_11 {dimension_numbers = #tpu.dot_dimension_numbers<[1], [0], [0], [1], [0, 0, 1, 1], [], []>} : vector<16x32xf32>, vector<32x4xf32>, vector<16x4xf32> -> vector<16x4xf32>
    %cst_12 = arith.constant 1.000000e-01 : f32
    %12 = vector.broadcast %cst_12 : f32 to vector<16x4xf32>
    %13 = arith.mulf %12, %11 : vector<16x4xf32>
    %14 = arith.addf %3, %13 : vector<16x4xf32>
    %15 = arith.index_cast %c0_i32 : i32 to index
    %c0_13 = arith.constant 0 : index
    %c0_14 = arith.constant 0 : index
    %16 = vector.load %arg4[%15, %c0_13, %c0_14] : memref<8x16x4xf32, #tpu.memory_space<vmem>>, vector<1x16x4xf32>
    %17 = vector.shape_cast %16 : vector<1x16x4xf32> to vector<16x4xf32>
    %18 = vector.shape_cast %14 : vector<16x4xf32> to vector<1x16x4xf32>
    tpu.vector_store %arg4[%15, %c0_13, %c0_14], %18 {strides = array<i32>} : memref<8x16x4xf32, #tpu.memory_space<vmem>>, vector<1x16x4xf32>,
    %19 = arith.index_cast %c0_i32 : i32 to index
    %c0_15 = arith.constant 0 : index
    %c0_16 = arith.constant 0 : index
    %20 = vector.load %arg5[%19, %c0_15, %c0_16] : memref<8x16x4xf32, #tpu.memory_space<vmem>>, vector<1x16x4xf32>
    %21 = vector.shape_cast %20 : vector<1x16x4xf32> to vector<16x4xf32>
    %22 = vector.shape_cast %11 : vector<16x4xf32> to vector<1x16x4xf32>
    tpu.vector_store %arg5[%19, %c0_15, %c0_16], %22 {strides = array<i32>} : memref<8x16x4xf32, #tpu.memory_space<vmem>>, vector<1x16x4xf32>,
    %c1_i32 = arith.constant 1 : i32
    %cst_17 = arith.constant dense<0.000000e+00> : vector<16x4xf32>
    %23 = tpu.matmul %0, %14, %cst_17 {dimension_numbers = #tpu.dot_dimension_numbers<[1], [0], [0], [1], [0, 0, 1, 1], [], []>} : vector<16x16xf32>, vector<16x4xf32>, vector<16x4xf32> -> vector<16x4xf32>
    %cst_18 = arith.constant dense<0.000000e+00> : vector<16x4xf32>
    %24 = tpu.matmul %0, %23, %cst_18 {dimension_numbers = #tpu.dot_dimension_numbers<[1], [0], [0], [1], [0, 0, 1, 1], [], []>} : vector<16x16xf32>, vector<16x4xf32>, vector<16x4xf32> -> vector<16x4xf32>
    %cst_19 = arith.constant dense<0.000000e+00> : vector<16x4xf32>
    %25 = tpu.matmul %0, %24, %cst_19 {dimension_numbers = #tpu.dot_dimension_numbers<[1], [0], [0], [1], [0, 0, 1, 1], [], []>} : vector<16x16xf32>, vector<16x4xf32>, vector<16x4xf32> -> vector<16x4xf32>
    %26 = tpu.concatenate %14, %23, %24, %25 in 1 : vector<16x4xf32>, vector<16x4xf32>, vector<16x4xf32>, vector<16x4xf32> -> vector<16x16xf32>
    %cst_20 = arith.constant dense<0.000000e+00> : vector<16x32xf32>
    %27 = tpu.matmul %26, %1, %cst_20 {dimension_numbers = #tpu.dot_dimension_numbers<[1], [0], [0], [1], [0, 0, 1, 1], [], []>} : vector<16x16xf32>, vector<16x32xf32>, vector<16x32xf32> -> vector<16x32xf32>
    %28 = math.tanh %27 : vector<16x32xf32>
    %cst_21 = arith.constant dense<0.000000e+00> : vector<16x32xf32>
    %29 = tpu.matmul %0, %28, %cst_21 {dimension_numbers = #tpu.dot_dimension_numbers<[1], [0], [0], [1], [0, 0, 1, 1], [], []>} : vector<16x16xf32>, vector<16x32xf32>, vector<16x32xf32> -> vector<16x32xf32>
    %cst_22 = arith.constant dense<0.000000e+00> : vector<16x4xf32>
    %30 = tpu.matmul %29, %2, %cst_22 {dimension_numbers = #tpu.dot_dimension_numbers<[1], [0], [0], [1], [0, 0, 1, 1], [], []>} : vector<16x32xf32>, vector<32x4xf32>, vector<16x4xf32> -> vector<16x4xf32>
    %cst_23 = arith.constant 1.000000e-01 : f32
    %31 = vector.broadcast %cst_23 : f32 to vector<16x4xf32>
    %32 = arith.mulf %31, %30 : vector<16x4xf32>
    %33 = arith.addf %14, %32 : vector<16x4xf32>
    %34 = arith.index_cast %c1_i32 : i32 to index
    %c0_24 = arith.constant 0 : index
    %c0_25 = arith.constant 0 : index
    %35 = vector.load %arg4[%34, %c0_24, %c0_25] : memref<8x16x4xf32, #tpu.memory_space<vmem>>, vector<1x16x4xf32>
    %36 = vector.shape_cast %35 : vector<1x16x4xf32> to vector<16x4xf32>
    %37 = vector.shape_cast %33 : vector<16x4xf32> to vector<1x16x4xf32>
    tpu.vector_store %arg4[%34, %c0_24, %c0_25], %37 {strides = array<i32>} : memref<8x16x4xf32, #tpu.memory_space<vmem>>, vector<1x16x4xf32>,
    %38 = arith.index_cast %c1_i32 : i32 to index
    %c0_26 = arith.constant 0 : index
    %c0_27 = arith.constant 0 : index
    %39 = vector.load %arg5[%38, %c0_26, %c0_27] : memref<8x16x4xf32, #tpu.memory_space<vmem>>, vector<1x16x4xf32>
    %40 = vector.shape_cast %39 : vector<1x16x4xf32> to vector<16x4xf32>
    %41 = vector.shape_cast %30 : vector<16x4xf32> to vector<1x16x4xf32>
    tpu.vector_store %arg5[%38, %c0_26, %c0_27], %41 {strides = array<i32>} : memref<8x16x4xf32, #tpu.memory_space<vmem>>, vector<1x16x4xf32>,
    %c2_i32 = arith.constant 2 : i32
    %cst_28 = arith.constant dense<0.000000e+00> : vector<16x4xf32>
    %42 = tpu.matmul %0, %33, %cst_28 {dimension_numbers = #tpu.dot_dimension_numbers<[1], [0], [0], [1], [0, 0, 1, 1], [], []>} : vector<16x16xf32>, vector<16x4xf32>, vector<16x4xf32> -> vector<16x4xf32>
    %cst_29 = arith.constant dense<0.000000e+00> : vector<16x4xf32>
    %43 = tpu.matmul %0, %42, %cst_29 {dimension_numbers = #tpu.dot_dimension_numbers<[1], [0], [0], [1], [0, 0, 1, 1], [], []>} : vector<16x16xf32>, vector<16x4xf32>, vector<16x4xf32> -> vector<16x4xf32>
    %cst_30 = arith.constant dense<0.000000e+00> : vector<16x4xf32>
    %44 = tpu.matmul %0, %43, %cst_30 {dimension_numbers = #tpu.dot_dimension_numbers<[1], [0], [0], [1], [0, 0, 1, 1], [], []>} : vector<16x16xf32>, vector<16x4xf32>, vector<16x4xf32> -> vector<16x4xf32>
    %45 = tpu.concatenate %33, %42, %43, %44 in 1 : vector<16x4xf32>, vector<16x4xf32>, vector<16x4xf32>, vector<16x4xf32> -> vector<16x16xf32>
    %cst_31 = arith.constant dense<0.000000e+00> : vector<16x32xf32>
    %46 = tpu.matmul %45, %1, %cst_31 {dimension_numbers = #tpu.dot_dimension_numbers<[1], [0], [0], [1], [0, 0, 1, 1], [], []>} : vector<16x16xf32>, vector<16x32xf32>, vector<16x32xf32> -> vector<16x32xf32>
    %47 = math.tanh %46 : vector<16x32xf32>
    %cst_32 = arith.constant dense<0.000000e+00> : vector<16x32xf32>
    %48 = tpu.matmul %0, %47, %cst_32 {dimension_numbers = #tpu.dot_dimension_numbers<[1], [0], [0], [1], [0, 0, 1, 1], [], []>} : vector<16x16xf32>, vector<16x32xf32>, vector<16x32xf32> -> vector<16x32xf32>
    %cst_33 = arith.constant dense<0.000000e+00> : vector<16x4xf32>
    %49 = tpu.matmul %48, %2, %cst_33 {dimension_numbers = #tpu.dot_dimension_numbers<[1], [0], [0], [1], [0, 0, 1, 1], [], []>} : vector<16x32xf32>, vector<32x4xf32>, vector<16x4xf32> -> vector<16x4xf32>
    %cst_34 = arith.constant 1.000000e-01 : f32
    %50 = vector.broadcast %cst_34 : f32 to vector<16x4xf32>
    %51 = arith.mulf %50, %49 : vector<16x4xf32>
    %52 = arith.addf %33, %51 : vector<16x4xf32>
    %53 = arith.index_cast %c2_i32 : i32 to index
    %c0_35 = arith.constant 0 : index
    %c0_36 = arith.constant 0 : index
    %54 = vector.load %arg4[%53, %c0_35, %c0_36] : memref<8x16x4xf32, #tpu.memory_space<vmem>>, vector<1x16x4xf32>
    %55 = vector.shape_cast %54 : vector<1x16x4xf32> to vector<16x4xf32>
    %56 = vector.shape_cast %52 : vector<16x4xf32> to vector<1x16x4xf32>
    tpu.vector_store %arg4[%53, %c0_35, %c0_36], %56 {strides = array<i32>} : memref<8x16x4xf32, #tpu.memory_space<vmem>>, vector<1x16x4xf32>,
    %57 = arith.index_cast %c2_i32 : i32 to index
    %c0_37 = arith.constant 0 : index
    %c0_38 = arith.constant 0 : index
    %58 = vector.load %arg5[%57, %c0_37, %c0_38] : memref<8x16x4xf32, #tpu.memory_space<vmem>>, vector<1x16x4xf32>
    %59 = vector.shape_cast %58 : vector<1x16x4xf32> to vector<16x4xf32>
    %60 = vector.shape_cast %49 : vector<16x4xf32> to vector<1x16x4xf32>
    tpu.vector_store %arg5[%57, %c0_37, %c0_38], %60 {strides = array<i32>} : memref<8x16x4xf32, #tpu.memory_space<vmem>>, vector<1x16x4xf32>,
    %c3_i32 = arith.constant 3 : i32
    %cst_39 = arith.constant dense<0.000000e+00> : vector<16x4xf32>
    %61 = tpu.matmul %0, %52, %cst_39 {dimension_numbers = #tpu.dot_dimension_numbers<[1], [0], [0], [1], [0, 0, 1, 1], [], []>} : vector<16x16xf32>, vector<16x4xf32>, vector<16x4xf32> -> vector<16x4xf32>
    %cst_40 = arith.constant dense<0.000000e+00> : vector<16x4xf32>
    %62 = tpu.matmul %0, %61, %cst_40 {dimension_numbers = #tpu.dot_dimension_numbers<[1], [0], [0], [1], [0, 0, 1, 1], [], []>} : vector<16x16xf32>, vector<16x4xf32>, vector<16x4xf32> -> vector<16x4xf32>
    %cst_41 = arith.constant dense<0.000000e+00> : vector<16x4xf32>
    %63 = tpu.matmul %0, %62, %cst_41 {dimension_numbers = #tpu.dot_dimension_numbers<[1], [0], [0], [1], [0, 0, 1, 1], [], []>} : vector<16x16xf32>, vector<16x4xf32>, vector<16x4xf32> -> vector<16x4xf32>
    %64 = tpu.concatenate %52, %61, %62, %63 in 1 : vector<16x4xf32>, vector<16x4xf32>, vector<16x4xf32>, vector<16x4xf32> -> vector<16x16xf32>
    %cst_42 = arith.constant dense<0.000000e+00> : vector<16x32xf32>
    %65 = tpu.matmul %64, %1, %cst_42 {dimension_numbers = #tpu.dot_dimension_numbers<[1], [0], [0], [1], [0, 0, 1, 1], [], []>} : vector<16x16xf32>, vector<16x32xf32>, vector<16x32xf32> -> vector<16x32xf32>
    %66 = math.tanh %65 : vector<16x32xf32>
    %cst_43 = arith.constant dense<0.000000e+00> : vector<16x32xf32>
    %67 = tpu.matmul %0, %66, %cst_43 {dimension_numbers = #tpu.dot_dimension_numbers<[1], [0], [0], [1], [0, 0, 1, 1], [], []>} : vector<16x16xf32>, vector<16x32xf32>, vector<16x32xf32> -> vector<16x32xf32>
    %cst_44 = arith.constant dense<0.000000e+00> : vector<16x4xf32>
    %68 = tpu.matmul %67, %2, %cst_44 {dimension_numbers = #tpu.dot_dimension_numbers<[1], [0], [0], [1], [0, 0, 1, 1], [], []>} : vector<16x32xf32>, vector<32x4xf32>, vector<16x4xf32> -> vector<16x4xf32>
    %cst_45 = arith.constant 1.000000e-01 : f32
    %69 = vector.broadcast %cst_45 : f32 to vector<16x4xf32>
    %70 = arith.mulf %69, %68 : vector<16x4xf32>
    %71 = arith.addf %52, %70 : vector<16x4xf32>
    %72 = arith.index_cast %c3_i32 : i32 to index
    %c0_46 = arith.constant 0 : index
    %c0_47 = arith.constant 0 : index
    %73 = vector.load %arg4[%72, %c0_46, %c0_47] : memref<8x16x4xf32, #tpu.memory_space<vmem>>, vector<1x16x4xf32>
    %74 = vector.shape_cast %73 : vector<1x16x4xf32> to vector<16x4xf32>
    %75 = vector.shape_cast %71 : vector<16x4xf32> to vector<1x16x4xf32>
    tpu.vector_store %arg4[%72, %c0_46, %c0_47], %75 {strides = array<i32>} : memref<8x16x4xf32, #tpu.memory_space<vmem>>, vector<1x16x4xf32>,
    %76 = arith.index_cast %c3_i32 : i32 to index
    %c0_48 = arith.constant 0 : index
    %c0_49 = arith.constant 0 : index
    %77 = vector.load %arg5[%76, %c0_48, %c0_49] : memref<8x16x4xf32, #tpu.memory_space<vmem>>, vector<1x16x4xf32>
    %78 = vector.shape_cast %77 : vector<1x16x4xf32> to vector<16x4xf32>
    %79 = vector.shape_cast %68 : vector<16x4xf32> to vector<1x16x4xf32>
    tpu.vector_store %arg5[%76, %c0_48, %c0_49], %79 {strides = array<i32>} : memref<8x16x4xf32, #tpu.memory_space<vmem>>, vector<1x16x4xf32>,
    %c4_i32 = arith.constant 4 : i32
    %cst_50 = arith.constant dense<0.000000e+00> : vector<16x4xf32>
    %80 = tpu.matmul %0, %71, %cst_50 {dimension_numbers = #tpu.dot_dimension_numbers<[1], [0], [0], [1], [0, 0, 1, 1], [], []>} : vector<16x16xf32>, vector<16x4xf32>, vector<16x4xf32> -> vector<16x4xf32>
    %cst_51 = arith.constant dense<0.000000e+00> : vector<16x4xf32>
    %81 = tpu.matmul %0, %80, %cst_51 {dimension_numbers = #tpu.dot_dimension_numbers<[1], [0], [0], [1], [0, 0, 1, 1], [], []>} : vector<16x16xf32>, vector<16x4xf32>, vector<16x4xf32> -> vector<16x4xf32>
    %cst_52 = arith.constant dense<0.000000e+00> : vector<16x4xf32>
    %82 = tpu.matmul %0, %81, %cst_52 {dimension_numbers = #tpu.dot_dimension_numbers<[1], [0], [0], [1], [0, 0, 1, 1], [], []>} : vector<16x16xf32>, vector<16x4xf32>, vector<16x4xf32> -> vector<16x4xf32>
    %83 = tpu.concatenate %71, %80, %81, %82 in 1 : vector<16x4xf32>, vector<16x4xf32>, vector<16x4xf32>, vector<16x4xf32> -> vector<16x16xf32>
    %cst_53 = arith.constant dense<0.000000e+00> : vector<16x32xf32>
    %84 = tpu.matmul %83, %1, %cst_53 {dimension_numbers = #tpu.dot_dimension_numbers<[1], [0], [0], [1], [0, 0, 1, 1], [], []>} : vector<16x16xf32>, vector<16x32xf32>, vector<16x32xf32> -> vector<16x32xf32>
    %85 = math.tanh %84 : vector<16x32xf32>
    %cst_54 = arith.constant dense<0.000000e+00> : vector<16x32xf32>
    %86 = tpu.matmul %0, %85, %cst_54 {dimension_numbers = #tpu.dot_dimension_numbers<[1], [0], [0], [1], [0, 0, 1, 1], [], []>} : vector<16x16xf32>, vector<16x32xf32>, vector<16x32xf32> -> vector<16x32xf32>
    %cst_55 = arith.constant dense<0.000000e+00> : vector<16x4xf32>
    %87 = tpu.matmul %86, %2, %cst_55 {dimension_numbers = #tpu.dot_dimension_numbers<[1], [0], [0], [1], [0, 0, 1, 1], [], []>} : vector<16x32xf32>, vector<32x4xf32>, vector<16x4xf32> -> vector<16x4xf32>
    %cst_56 = arith.constant 1.000000e-01 : f32
    %88 = vector.broadcast %cst_56 : f32 to vector<16x4xf32>
    %89 = arith.mulf %88, %87 : vector<16x4xf32>
    %90 = arith.addf %71, %89 : vector<16x4xf32>
    %91 = arith.index_cast %c4_i32 : i32 to index
    %c0_57 = arith.constant 0 : index
    %c0_58 = arith.constant 0 : index
    %92 = vector.load %arg4[%91, %c0_57, %c0_58] : memref<8x16x4xf32, #tpu.memory_space<vmem>>, vector<1x16x4xf32>
    %93 = vector.shape_cast %92 : vector<1x16x4xf32> to vector<16x4xf32>
    %94 = vector.shape_cast %90 : vector<16x4xf32> to vector<1x16x4xf32>
    tpu.vector_store %arg4[%91, %c0_57, %c0_58], %94 {strides = array<i32>} : memref<8x16x4xf32, #tpu.memory_space<vmem>>, vector<1x16x4xf32>,
    %95 = arith.index_cast %c4_i32 : i32 to index
    %c0_59 = arith.constant 0 : index
    %c0_60 = arith.constant 0 : index
    %96 = vector.load %arg5[%95, %c0_59, %c0_60] : memref<8x16x4xf32, #tpu.memory_space<vmem>>, vector<1x16x4xf32>
    %97 = vector.shape_cast %96 : vector<1x16x4xf32> to vector<16x4xf32>
    %98 = vector.shape_cast %87 : vector<16x4xf32> to vector<1x16x4xf32>
    tpu.vector_store %arg5[%95, %c0_59, %c0_60], %98 {strides = array<i32>} : memref<8x16x4xf32, #tpu.memory_space<vmem>>, vector<1x16x4xf32>,
    %c5_i32 = arith.constant 5 : i32
    %cst_61 = arith.constant dense<0.000000e+00> : vector<16x4xf32>
    %99 = tpu.matmul %0, %90, %cst_61 {dimension_numbers = #tpu.dot_dimension_numbers<[1], [0], [0], [1], [0, 0, 1, 1], [], []>} : vector<16x16xf32>, vector<16x4xf32>, vector<16x4xf32> -> vector<16x4xf32>
    %cst_62 = arith.constant dense<0.000000e+00> : vector<16x4xf32>
    %100 = tpu.matmul %0, %99, %cst_62 {dimension_numbers = #tpu.dot_dimension_numbers<[1], [0], [0], [1], [0, 0, 1, 1], [], []>} : vector<16x16xf32>, vector<16x4xf32>, vector<16x4xf32> -> vector<16x4xf32>
    %cst_63 = arith.constant dense<0.000000e+00> : vector<16x4xf32>
    %101 = tpu.matmul %0, %100, %cst_63 {dimension_numbers = #tpu.dot_dimension_numbers<[1], [0], [0], [1], [0, 0, 1, 1], [], []>} : vector<16x16xf32>, vector<16x4xf32>, vector<16x4xf32> -> vector<16x4xf32>
    %102 = tpu.concatenate %90, %99, %100, %101 in 1 : vector<16x4xf32>, vector<16x4xf32>, vector<16x4xf32>, vector<16x4xf32> -> vector<16x16xf32>
    %cst_64 = arith.constant dense<0.000000e+00> : vector<16x32xf32>
    %103 = tpu.matmul %102, %1, %cst_64 {dimension_numbers = #tpu.dot_dimension_numbers<[1], [0], [0], [1], [0, 0, 1, 1], [], []>} : vector<16x16xf32>, vector<16x32xf32>, vector<16x32xf32> -> vector<16x32xf32>
    %104 = math.tanh %103 : vector<16x32xf32>
    %cst_65 = arith.constant dense<0.000000e+00> : vector<16x32xf32>
    %105 = tpu.matmul %0, %104, %cst_65 {dimension_numbers = #tpu.dot_dimension_numbers<[1], [0], [0], [1], [0, 0, 1, 1], [], []>} : vector<16x16xf32>, vector<16x32xf32>, vector<16x32xf32> -> vector<16x32xf32>
    %cst_66 = arith.constant dense<0.000000e+00> : vector<16x4xf32>
    %106 = tpu.matmul %105, %2, %cst_66 {dimension_numbers = #tpu.dot_dimension_numbers<[1], [0], [0], [1], [0, 0, 1, 1], [], []>} : vector<16x32xf32>, vector<32x4xf32>, vector<16x4xf32> -> vector<16x4xf32>
    %cst_67 = arith.constant 1.000000e-01 : f32
    %107 = vector.broadcast %cst_67 : f32 to vector<16x4xf32>
    %108 = arith.mulf %107, %106 : vector<16x4xf32>
    %109 = arith.addf %90, %108 : vector<16x4xf32>
    %110 = arith.index_cast %c5_i32 : i32 to index
    %c0_68 = arith.constant 0 : index
    %c0_69 = arith.constant 0 : index
    %111 = vector.load %arg4[%110, %c0_68, %c0_69] : memref<8x16x4xf32, #tpu.memory_space<vmem>>, vector<1x16x4xf32>
    %112 = vector.shape_cast %111 : vector<1x16x4xf32> to vector<16x4xf32>
    %113 = vector.shape_cast %109 : vector<16x4xf32> to vector<1x16x4xf32>
    tpu.vector_store %arg4[%110, %c0_68, %c0_69], %113 {strides = array<i32>} : memref<8x16x4xf32, #tpu.memory_space<vmem>>, vector<1x16x4xf32>,
    %114 = arith.index_cast %c5_i32 : i32 to index
    %c0_70 = arith.constant 0 : index
    %c0_71 = arith.constant 0 : index
    %115 = vector.load %arg5[%114, %c0_70, %c0_71] : memref<8x16x4xf32, #tpu.memory_space<vmem>>, vector<1x16x4xf32>
    %116 = vector.shape_cast %115 : vector<1x16x4xf32> to vector<16x4xf32>
    %117 = vector.shape_cast %106 : vector<16x4xf32> to vector<1x16x4xf32>
    tpu.vector_store %arg5[%114, %c0_70, %c0_71], %117 {strides = array<i32>} : memref<8x16x4xf32, #tpu.memory_space<vmem>>, vector<1x16x4xf32>,
    %c6_i32 = arith.constant 6 : i32
    %cst_72 = arith.constant dense<0.000000e+00> : vector<16x4xf32>
    %118 = tpu.matmul %0, %109, %cst_72 {dimension_numbers = #tpu.dot_dimension_numbers<[1], [0], [0], [1], [0, 0, 1, 1], [], []>} : vector<16x16xf32>, vector<16x4xf32>, vector<16x4xf32> -> vector<16x4xf32>
    %cst_73 = arith.constant dense<0.000000e+00> : vector<16x4xf32>
    %119 = tpu.matmul %0, %118, %cst_73 {dimension_numbers = #tpu.dot_dimension_numbers<[1], [0], [0], [1], [0, 0, 1, 1], [], []>} : vector<16x16xf32>, vector<16x4xf32>, vector<16x4xf32> -> vector<16x4xf32>
    %cst_74 = arith.constant dense<0.000000e+00> : vector<16x4xf32>
    %120 = tpu.matmul %0, %119, %cst_74 {dimension_numbers = #tpu.dot_dimension_numbers<[1], [0], [0], [1], [0, 0, 1, 1], [], []>} : vector<16x16xf32>, vector<16x4xf32>, vector<16x4xf32> -> vector<16x4xf32>
    %121 = tpu.concatenate %109, %118, %119, %120 in 1 : vector<16x4xf32>, vector<16x4xf32>, vector<16x4xf32>, vector<16x4xf32> -> vector<16x16xf32>
    %cst_75 = arith.constant dense<0.000000e+00> : vector<16x32xf32>
    %122 = tpu.matmul %121, %1, %cst_75 {dimension_numbers = #tpu.dot_dimension_numbers<[1], [0], [0], [1], [0, 0, 1, 1], [], []>} : vector<16x16xf32>, vector<16x32xf32>, vector<16x32xf32> -> vector<16x32xf32>
    %123 = math.tanh %122 : vector<16x32xf32>
    %cst_76 = arith.constant dense<0.000000e+00> : vector<16x32xf32>
    %124 = tpu.matmul %0, %123, %cst_76 {dimension_numbers = #tpu.dot_dimension_numbers<[1], [0], [0], [1], [0, 0, 1, 1], [], []>} : vector<16x16xf32>, vector<16x32xf32>, vector<16x32xf32> -> vector<16x32xf32>
    %cst_77 = arith.constant dense<0.000000e+00> : vector<16x4xf32>
    %125 = tpu.matmul %124, %2, %cst_77 {dimension_numbers = #tpu.dot_dimension_numbers<[1], [0], [0], [1], [0, 0, 1, 1], [], []>} : vector<16x32xf32>, vector<32x4xf32>, vector<16x4xf32> -> vector<16x4xf32>
    %cst_78 = arith.constant 1.000000e-01 : f32
    %126 = vector.broadcast %cst_78 : f32 to vector<16x4xf32>
    %127 = arith.mulf %126, %125 : vector<16x4xf32>
    %128 = arith.addf %109, %127 : vector<16x4xf32>
    %129 = arith.index_cast %c6_i32 : i32 to index
    %c0_79 = arith.constant 0 : index
    %c0_80 = arith.constant 0 : index
    %130 = vector.load %arg4[%129, %c0_79, %c0_80] : memref<8x16x4xf32, #tpu.memory_space<vmem>>, vector<1x16x4xf32>
    %131 = vector.shape_cast %130 : vector<1x16x4xf32> to vector<16x4xf32>
    %132 = vector.shape_cast %128 : vector<16x4xf32> to vector<1x16x4xf32>
    tpu.vector_store %arg4[%129, %c0_79, %c0_80], %132 {strides = array<i32>} : memref<8x16x4xf32, #tpu.memory_space<vmem>>, vector<1x16x4xf32>,
    %133 = arith.index_cast %c6_i32 : i32 to index
    %c0_81 = arith.constant 0 : index
    %c0_82 = arith.constant 0 : index
    %134 = vector.load %arg5[%133, %c0_81, %c0_82] : memref<8x16x4xf32, #tpu.memory_space<vmem>>, vector<1x16x4xf32>
    %135 = vector.shape_cast %134 : vector<1x16x4xf32> to vector<16x4xf32>
    %136 = vector.shape_cast %125 : vector<16x4xf32> to vector<1x16x4xf32>
    tpu.vector_store %arg5[%133, %c0_81, %c0_82], %136 {strides = array<i32>} : memref<8x16x4xf32, #tpu.memory_space<vmem>>, vector<1x16x4xf32>,
    %c7_i32 = arith.constant 7 : i32
    %cst_83 = arith.constant dense<0.000000e+00> : vector<16x4xf32>
    %137 = tpu.matmul %0, %128, %cst_83 {dimension_numbers = #tpu.dot_dimension_numbers<[1], [0], [0], [1], [0, 0, 1, 1], [], []>} : vector<16x16xf32>, vector<16x4xf32>, vector<16x4xf32> -> vector<16x4xf32>
    %cst_84 = arith.constant dense<0.000000e+00> : vector<16x4xf32>
    %138 = tpu.matmul %0, %137, %cst_84 {dimension_numbers = #tpu.dot_dimension_numbers<[1], [0], [0], [1], [0, 0, 1, 1], [], []>} : vector<16x16xf32>, vector<16x4xf32>, vector<16x4xf32> -> vector<16x4xf32>
    %cst_85 = arith.constant dense<0.000000e+00> : vector<16x4xf32>
    %139 = tpu.matmul %0, %138, %cst_85 {dimension_numbers = #tpu.dot_dimension_numbers<[1], [0], [0], [1], [0, 0, 1, 1], [], []>} : vector<16x16xf32>, vector<16x4xf32>, vector<16x4xf32> -> vector<16x4xf32>
    %140 = tpu.concatenate %128, %137, %138, %139 in 1 : vector<16x4xf32>, vector<16x4xf32>, vector<16x4xf32>, vector<16x4xf32> -> vector<16x16xf32>
    %cst_86 = arith.constant dense<0.000000e+00> : vector<16x32xf32>
    %141 = tpu.matmul %140, %1, %cst_86 {dimension_numbers = #tpu.dot_dimension_numbers<[1], [0], [0], [1], [0, 0, 1, 1], [], []>} : vector<16x16xf32>, vector<16x32xf32>, vector<16x32xf32> -> vector<16x32xf32>
    %142 = math.tanh %141 : vector<16x32xf32>
    %cst_87 = arith.constant dense<0.000000e+00> : vector<16x32xf32>
    %143 = tpu.matmul %0, %142, %cst_87 {dimension_numbers = #tpu.dot_dimension_numbers<[1], [0], [0], [1], [0, 0, 1, 1], [], []>} : vector<16x16xf32>, vector<16x32xf32>, vector<16x32xf32> -> vector<16x32xf32>
    %cst_88 = arith.constant dense<0.000000e+00> : vector<16x4xf32>
    %144 = tpu.matmul %143, %2, %cst_88 {dimension_numbers = #tpu.dot_dimension_numbers<[1], [0], [0], [1], [0, 0, 1, 1], [], []>} : vector<16x32xf32>, vector<32x4xf32>, vector<16x4xf32> -> vector<16x4xf32>
    %cst_89 = arith.constant 1.000000e-01 : f32
    %145 = vector.broadcast %cst_89 : f32 to vector<16x4xf32>
    %146 = arith.mulf %145, %144 : vector<16x4xf32>
    %147 = arith.addf %128, %146 : vector<16x4xf32>
    %148 = arith.index_cast %c7_i32 : i32 to index
    %c0_90 = arith.constant 0 : index
    %c0_91 = arith.constant 0 : index
    %149 = vector.load %arg4[%148, %c0_90, %c0_91] : memref<8x16x4xf32, #tpu.memory_space<vmem>>, vector<1x16x4xf32>
    %150 = vector.shape_cast %149 : vector<1x16x4xf32> to vector<16x4xf32>
    %151 = vector.shape_cast %147 : vector<16x4xf32> to vector<1x16x4xf32>
    tpu.vector_store %arg4[%148, %c0_90, %c0_91], %151 {strides = array<i32>} : memref<8x16x4xf32, #tpu.memory_space<vmem>>, vector<1x16x4xf32>,
    %152 = arith.index_cast %c7_i32 : i32 to index
    %c0_92 = arith.constant 0 : index
    %c0_93 = arith.constant 0 : index
    %153 = vector.load %arg5[%152, %c0_92, %c0_93] : memref<8x16x4xf32, #tpu.memory_space<vmem>>, vector<1x16x4xf32>
    %154 = vector.shape_cast %153 : vector<1x16x4xf32> to vector<16x4xf32>
    %155 = vector.shape_cast %144 : vector<16x4xf32> to vector<1x16x4xf32>
    tpu.vector_store %arg5[%152, %c0_92, %c0_93], %155 {strides = array<i32>} : memref<8x16x4xf32, #tpu.memory_space<vmem>>, vector<1x16x4xf32>,
    %c8_i32 = arith.constant 8 : i32
    return
  }
}

</mosaic_0001>

<bundles_post_ra>
// kernel: gcnn_forward.1
= control target key start
LH: loop header
LB: loop body
LE: loop exit
PB: predicated region body
PF: predicated region fallthrough
CT: control target
= control target key end

     0   :  { %vm29_vm0 = vcmask 130048   ;;  %s5040_s26 = smov 8   ;;  %s5041_s6 = smov 12   ;;  %vm285_vm1 = vcmask 31744   ;;  %vm288_vm2 = vcmask 64512   ;;  %vm291_vm3 = vcmask 97280   ;;  %s5636_s0 = inlined_call_operand.vmem [shape: f32[16,4], index: 0, kind: input, shape index: {}]   ;;  %s5637_s1 = inlined_call_operand.vmem [shape: f32[16,16], index: 1, kind: input, shape index: {}]   ;;  %s5638_s2 = inlined_call_operand.vmem [shape: f32[16,32], index: 2, kind: input, shape index: {}]   ;;  %s5639_s3 = inlined_call_operand.vmem [shape: f32[32,4], index: 3, kind: input, shape index: {}]   ;;  %s5640_s5 = inlined_call_operand.vmem [shape: f32[8,16,4], index: 5, kind: output, shape index: {1}]   ;;  %s5641_s4 = inlined_call_operand.vmem [shape: f32[8,16,4], index: 4, kind: output, shape index: {0}]  }
   0x1   :  { %v5075_v0 = vld [vmem:[%s5636_s0] sm:$0xff]  ;;  %v5080_v1 = vld [vmem:[%s5636_s0 + $0x8] sm:$0xff]  ;;  %s5039_s0 = smov 4   ;;  %v25_v30 = vld [vmem:[%s5639_s3 + $0x10] sm:$0xff]  ;;  %vm452_vm4 = vcmask 261120  }
   0x2   :  { %v5085_v2 = vld [vmem:[%s5637_s1] sm:$0xff]  ;;  %v4778_v3 = vpack.c.bf16 %v5080_v1, %v5075_v0  ;;  %v5096_v4 = vld [vmem:[%s5637_s1 + $0x8] sm:$0xff]  ;;  %v26_v32 = vld [vmem:[%s5639_s3 + $0x18] sm:$0xff] }
   0x3   :  { %4414 = vmatprep.mubr.msk.f32.mxu1 %vm29_vm0, %v5085_v2  ;;  %4428 = vmatprep.mubr.msk.f32.mxu0 %vm29_vm0, %v5085_v2  ;;  %v21_v11 = vld [vmem:[%s5638_s2] sm:$0xff]  ;;  %v22_v12 = vld [vmem:[%s5638_s2 + $0x8] sm:$0xff]  ;;  %v5148_v33 = vpack.c.bf16 %v26_v32, %v25_v30 }
   0x4   :  { %4779 = vmatprep.subr.bf16.mxu1 %v4778_v3  ;;  %v5118_v13 = vpack.c.bf16 %v22_v12, %v21_v11  ;;  %v23_v28 = vld [vmem:[%s5639_s3] sm:$0xff]  ;;  %v24_v29 = vld [vmem:[%s5639_s3 + $0x8] sm:$0xff] }
   0x5   :  { %4781 = vmatpush3.bf16.msra.mxu1 %v4778_v3  ;;  %v5143_v31 = vpack.c.bf16 %v24_v29, %v23_v28 }
   0x8   :  { %4415 = vmatmul.mubr.msk.f32.vlgmr.msra.gmra.mrb[0].mxu1 %vm29_vm0, %v5096_v4 }
   0x9   :  { %4421 = vmatprep.mubr.msk.f32.mxu1 %vm29_vm0, %v5085_v2 }
  0xdb   :  { %v4416_v5 = vpop.f32.mrb[0].mxu1 }
  0xdc   :  { %265 = vrot.lane.b32.xlu0 %v4416_v5, %s5039_s0  ;;  %v102_v6 = vpop.f32.mrb[1].mxu1 }
  0xdd   :  { %v4782_v7 = vpack.c.bf16 %v4416_v5, %v102_v6 }
  0xdf   :  { %4783 = vmatprep.subr.bf16.mxu1 %v4782_v7 }
  0xe0   :  { %263 = vrot.lane.b32.xlu0 %v102_v6, %s5039_s0  ;;  %4785 = vmatpush3.bf16.msra.mxu1 %v4782_v7 }
  0xe1   :  { %4791 = vmatprep.subr.bf16.mxu1 %v5118_v13 }
  0xe3   :  { %4422 = vmatmul.mubr.msk.f32.vlgmr.msra.gmra.mrb[2].mxu1 %vm29_vm0, %v5096_v4 }
  0xe4   :  { %4793 = vmatpush3.bf16.msra.mxu1 %v5118_v13 }
  0xe5   :  { %4799 = vmatprep.subr.bf16.mxu1 %v5143_v31 }
 0x14e   :  { %v266_v17 = vpop.permute.xlu0 %265 }
 0x14f   :  { %v287_v22 = vsel %vm285_vm1, %v5080_v1, %v266_v17 }
 0x152   :  { %v264_v19 = vpop.permute.xlu0 %263 }
 0x153   :  { %v286_v20 = vsel %vm285_vm1, %v5075_v0, %v264_v19 }
 0x1b6   :  { %v4423_v8 = vpop.f32.mrb[2].mxu1 }
 0x1b7   :  { %273 = vrot.lane.b32.xlu1 %v4423_v8, %s5040_s26  ;;  %v177_v9 = vpop.f32.mrb[3].mxu1 }
 0x1b8   :  { %v4786_v10 = vpack.c.bf16 %v4423_v8, %v177_v9 }
 0x1ba   :  { %4787 = vmatprep.subr.bf16.mxu0 %v4786_v10 }
 0x1bb   :  { %271 = vrot.lane.b32.xlu1 %v177_v9, %s5040_s26  ;;  %4789 = vmatpush3.bf16.msra.mxu0 %v4786_v10 }
 0x1be   :  { %4429 = vmatmul.mubr.msk.f32.vlgmr.msra.gmra.mrb[0].mxu0 %vm29_vm0, %v5096_v4 }
 0x1bf   :  { %4442 = vmatprep.mubr.msk.f32.mxu0 %vm29_vm0, %v5085_v2 }
 0x229   :  { %v274_v16 = vpop.permute.xlu1 %273 }
 0x22a   :  { %v290_v25 = vsel %vm288_vm2, %v287_v22, %v274_v16 }
 0x22d   :  { %v272_v18 = vpop.permute.xlu1 %271 }
 0x22e   :  { %v289_v23 = vsel %vm288_vm2, %v286_v20, %v272_v18 }
 0x291   :  { %v4430_v14 = vpop.f32.mrb[0].mxu0 }
 0x292   :  { %281 = vrot.lane.b32.xlu1 %v4430_v14, %s5041_s6  ;;  %v252_v15 = vpop.f32.mrb[1].mxu0 }
 0x293   :  { %279 = vrot.lane.b32.xlu0 %v252_v15, %s5041_s6 }
 0x304   :  { %v282_v21 = vpop.permute.xlu1 %281 }
 0x305   :  { %v280_v24 = vpop.permute.xlu0 %279  ;;  %v293_v27 = vsel %vm291_vm3, %v290_v25, %v282_v21 }
 0x306   :  { %v292_v26 = vsel %vm291_vm3, %v289_v23, %v280_v24 }
 0x307   :  { %4435 = vmatprep.mubr.msk.f32.mxu1 %vm29_vm0, %v292_v26 }
 0x308   :  { %4436 = vmatmul.mubr.msk.f32.vlgmr.msra.gmra.mrb[4].mxu1 %vm29_vm0, %v293_v27 }
 0x309   :  { %4801 = vmatpush3.bf16.msra.mxu1 %v5143_v31 }
 0x30a   :  { %4803 = vmatprep.subr.bf16.mxu1 %v5148_v33 }
 0x30d   :  { %4805 = vmatpush3.bf16.msra.mxu1 %v5148_v33 }
 0x3db   :  { %v4437_v34 = vpop.f32.mrb[4].mxu1 }
 0x3dc   :  { %5005 = vtanh.f32 %v4437_v34  ;;  %v366_v35 = vpop.f32.mrb[5].mxu1 }
 0x3dd   :  { %5007 = vtanh.f32 %v366_v35 }
 0x3e6   :  { %v5006_v36 = vpop.eup %5005 }
 0x3e7   :  { %v5008_v37 = vpop.eup %5007 }
 0x3e8   :  { %v4794_v38 = vpack.c.bf16 %v5006_v36, %v5008_v37 }
 0x3ea   :  { %4795 = vmatprep.subr.bf16.mxu0 %v4794_v38 }
 0x3eb   :  { %4797 = vmatpush3.bf16.msra.mxu0 %v4794_v38 }
 0x3ee   :  { %4443 = vmatmul.mubr.msk.f32.vlgmr.msra.gmra.mrb[2].mxu0 %vm29_vm0, %v5096_v4 }
 0x3ef   :  { %4460 = vmatprep.mubr.msk.f32.mxu0 %vm29_vm0, %v5085_v2 }
 0x4c1   :  { %v4444_v39 = vpop.f32.mrb[2].mxu0 }
 0x4c2   :  { %v443_v40 = vpop.f32.mrb[3].mxu0 }
 0x4c3   :  { %4453 = vmatprep.mubr.msk.f32.mxu1 %vm452_vm4, %v443_v40 }
 0x4c4   :  { %4454 = vmatmul.mubr.msk.f32.vlgmr.msra.gmra.mrb[6].mxu1 %vm452_vm4, %v4444_v39 }
 0x4c5   :  { %4474 = vmatprep.mubr.msk.f32.mxu1 %vm29_vm0, %v5085_v2 }
 0x597   :  { %v4455_v41 = vpop.f32.mrb[6].mxu1 }
 0x598   :  { %v535_v42 = vmul.f32 0.1, %v4455_v41  ;;  %541 = vst.msk [vmem:[%s5640_s5 + $0x8] sm:$0xff] %vm285_vm1, %v4455_v41  ;;  %v525_v43 = vpop.f32.mrb[7].mxu1 }
 0x599   :  { %v534_v44 = vmul.f32 0.1, %v525_v43  ;;  %540 = vst.msk [vmem:[%s5640_s5] sm:$0xff] %vm285_vm1, %v525_v43 }
 0x59a   :  { %v5171_v45 = vadd.f32 %v535_v42, %v5080_v1 }
 0x59b   :  { %v5174_v46 = vadd.f32 %v534_v44, %v5075_v0 }
 0x59c   :  { %539 = vst.msk [vmem:[%s5641_s4 + $0x8] sm:$0xff] %vm285_vm1, %v5171_v45 }
 0x59d   :  { %538 = vst.msk [vmem:[%s5641_s4] sm:$0xff] %vm285_vm1, %v5174_v46  ;;  %v4806_v47 = vpack.c.bf16 %v5171_v45, %v5174_v46 }
 0x59f   :  { %4807 = vmatprep.subr.bf16.mxu0 %v4806_v47 }
 0x5a0   :  { %4809 = vmatpush3.bf16.msra.mxu0 %v4806_v47 }
 0x5a3   :  { %4461 = vmatmul.mubr.msk.f32.vlgmr.msra.gmra.mrb[4].mxu0 %vm29_vm0, %v5096_v4 }
 0x5a4   :  { %4467 = vmatprep.mubr.msk.f32.mxu0 %vm29_vm0, %v5085_v2 }
 0x676   :  { %v4462_v48 = vpop.f32.mrb[4].mxu0 }
 0x677   :  { %771 = vrot.lane.b32.xlu1 %v4462_v48, %s5039_s0  ;;  %v608_v49 = vpop.f32.mrb[5].mxu0 }
 0x678   :  { %v4810_v50 = vpack.c.bf16 %v4462_v48, %v608_v49  ;;  %769 = vrot.lane.b32.xlu0 %v608_v49, %s5039_s0 }
 0x67a   :  { %4811 = vmatprep.subr.bf16.mxu0 %v4810_v50 }
 0x67b   :  { %4813 = vmatpush3.bf16.msra.mxu0 %v4810_v50 }
 0x67c   :  { %4819 = vmatprep.subr.bf16.mxu0 %v5118_v13 }
 0x67e   :  { %4468 = vmatmul.mubr.msk.f32.vlgmr.msra.gmra.mrb[6].mxu0 %vm29_vm0, %v5096_v4 }
 0x67f   :  { %4821 = vmatpush3.bf16.msra.mxu0 %v5118_v13 }
 0x680   :  { %4827 = vmatprep.subr.bf16.mxu0 %v5143_v31 }
 0x6e9   :  { %v772_v56 = vpop.permute.xlu1 %771 }
 0x6ea   :  { %v770_v57 = vpop.permute.xlu0 %769  ;;  %v792_v62 = vsel %vm285_vm1, %v5171_v45, %v772_v56 }
 0x6eb   :  { %v791_v60 = vsel %vm285_vm1, %v5174_v46, %v770_v57 }
 0x751   :  { %v4469_v51 = vpop.f32.mrb[6].mxu0 }
 0x752   :  { %779 = vrot.lane.b32.xlu1 %v4469_v51, %s5040_s26  ;;  %v683_v52 = vpop.f32.mrb[7].mxu0 }
 0x753   :  { %v4814_v53 = vpack.c.bf16 %v4469_v51, %v683_v52  ;;  %777 = vrot.lane.b32.xlu0 %v683_v52, %s5040_s26 }
 0x755   :  { %4815 = vmatprep.subr.bf16.mxu1 %v4814_v53 }
 0x756   :  { %4817 = vmatpush3.bf16.msra.mxu1 %v4814_v53 }
 0x759   :  { %4475 = vmatmul.mubr.msk.f32.vlgmr.msra.gmra.mrb[8].mxu1 %vm29_vm0, %v5096_v4 }
 0x75a   :  { %4488 = vmatprep.mubr.msk.f32.mxu1 %vm29_vm0, %v5085_v2 }
 0x7c4   :  { %v780_v58 = vpop.permute.xlu1 %779 }
 0x7c5   :  { %v778_v59 = vpop.permute.xlu0 %777  ;;  %v794_v1 = vsel %vm288_vm2, %v792_v62, %v780_v58 }
 0x7c6   :  { %v793_v63 = vsel %vm288_vm2, %v791_v60, %v778_v59 }
 0x82c   :  { %v4476_v54 = vpop.f32.mrb[8].mxu1 }
 0x82d   :  { %787 = vrot.lane.b32.xlu1 %v4476_v54, %s5041_s6  ;;  %v758_v55 = vpop.f32.mrb[9].mxu1 }
 0x82e   :  { %785 = vrot.lane.b32.xlu0 %v758_v55, %s5041_s6 }
 0x89f   :  { %v788_v61 = vpop.permute.xlu1 %787 }
 0x8a0   :  { %v786_v0 = vpop.permute.xlu0 %785  ;;  %v796_v5 = vsel %vm291_vm3, %v794_v1, %v788_v61 }
 0x8a1   :  { %v795_v3 = vsel %vm291_vm3, %v793_v63, %v786_v0 }
 0x8a2   :  { %4481 = vmatprep.mubr.msk.f32.mxu0 %vm29_vm0, %v795_v3 }
 0x8a3   :  { %4482 = vmatmul.mubr.msk.f32.vlgmr.msra.gmra.mrb[8].mxu0 %vm29_vm0, %v796_v5 }
 0x8a4   :  { %4829 = vmatpush3.bf16.msra.mxu0 %v5143_v31 }
 0x8a5   :  { %4831 = vmatprep.subr.bf16.mxu0 %v5148_v33 }
 0x8a8   :  { %4833 = vmatpush3.bf16.msra.mxu0 %v5148_v33 }
 0x976   :  { %v4483_v6 = vpop.f32.mrb[8].mxu0 }
 0x977   :  { %5009 = vtanh.f32 %v4483_v6  ;;  %v869_v7 = vpop.f32.mrb[9].mxu0 }
 0x978   :  { %5011 = vtanh.f32 %v869_v7 }
 0x981   :  { %v5010_v8 = vpop.eup %5009 }
 0x982   :  { %v5012_v9 = vpop.eup %5011 }
 0x983   :  { %v4822_v10 = vpack.c.bf16 %v5010_v8, %v5012_v9 }
 0x985   :  { %4823 = vmatprep.subr.bf16.mxu1 %v4822_v10 }
 0x986   :  { %4825 = vmatpush3.bf16.msra.mxu1 %v4822_v10 }
 0x989   :  { %4489 = vmatmul.mubr.msk.f32.vlgmr.msra.gmra.mrb[10].mxu1 %vm29_vm0, %v5096_v4 }
 0x98a   :  { %4506 = vmatprep.mubr.msk.f32.mxu1 %vm29_vm0, %v5085_v2 }
 0xa5c   :  { %v4490_v11 = vpop.f32.mrb[10].mxu1 }
 0xa5d   :  { %v946_v12 = vpop.f32.mrb[11].mxu1 }
 0xa5e   :  { %4499 = vmatprep.mubr.msk.f32.mxu0 %vm452_vm4, %v946_v12 }
 0xa5f   :  { %4500 = vmatmul.mubr.msk.f32.vlgmr.msra.gmra.mrb[10].mxu0 %vm452_vm4, %v4490_v11 }
 0xa60   :  { %4520 = vmatprep.mubr.msk.f32.mxu0 %vm29_vm0, %v5085_v2 }
 0xb32   :  { %v4501_v14 = vpop.f32.mrb[10].mxu0 }
 0xb33   :  { %v1037_v15 = vmul.f32 0.1, %v4501_v14  ;;  %4105 = vst.msk [vmem:[%s5640_s5 + $0x18] sm:$0xff] %vm285_vm1, %v4501_v14  ;;  %v1027_v16 = vpop.f32.mrb[11].mxu0 }
 0xb34   :  { %v1036_v17 = vmul.f32 0.1, %v1027_v16  ;;  %4104 = vst.msk [vmem:[%s5640_s5 + $0x10] sm:$0xff] %vm285_vm1, %v1027_v16 }
 0xb35   :  { %v5237_v18 = vadd.f32 %v1037_v15, %v5171_v45 }
 0xb36   :  { %v5240_v19 = vadd.f32 %v1036_v17, %v5174_v46 }
 0xb37   :  { %4103 = vst.msk [vmem:[%s5641_s4 + $0x18] sm:$0xff] %vm285_vm1, %v5237_v18 }
 0xb38   :  { %4102 = vst.msk [vmem:[%s5641_s4 + $0x10] sm:$0xff] %vm285_vm1, %v5240_v19  ;;  %v4834_v20 = vpack.c.bf16 %v5237_v18, %v5240_v19 }
 0xb3a   :  { %4835 = vmatprep.subr.bf16.mxu1 %v4834_v20 }
 0xb3b   :  { %4837 = vmatpush3.bf16.msra.mxu1 %v4834_v20 }
 0xb3e   :  { %4507 = vmatmul.mubr.msk.f32.vlgmr.msra.gmra.mrb[12].mxu1 %vm29_vm0, %v5096_v4 }
 0xb3f   :  { %4513 = vmatprep.mubr.msk.f32.mxu1 %vm29_vm0, %v5085_v2 }
 0xc11   :  { %v4508_v21 = vpop.f32.mrb[12].mxu1 }
 0xc12   :  { %1275 = vrot.lane.b32.xlu1 %v4508_v21, %s5039_s0  ;;  %v1112_v22 = vpop.f32.mrb[13].mxu1 }
 0xc13   :  { %v4838_v23 = vpack.c.bf16 %v4508_v21, %v1112_v22  ;;  %1273 = vrot.lane.b32.xlu0 %v1112_v22, %s5039_s0 }
 0xc15   :  { %4839 = vmatprep.subr.bf16.mxu1 %v4838_v23 }
 0xc16   :  { %4841 = vmatpush3.bf16.msra.mxu1 %v4838_v23 }
 0xc17   :  { %4847 = vmatprep.subr.bf16.mxu1 %v5118_v13 }
 0xc19   :  { %4514 = vmatmul.mubr.msk.f32.vlgmr.msra.gmra.mrb[14].mxu1 %vm29_vm0, %v5096_v4 }
 0xc1a   :  { %4849 = vmatpush3.bf16.msra.mxu1 %v5118_v13 }
 0xc1b   :  { %4855 = vmatprep.subr.bf16.mxu1 %v5143_v31 }
 0xc84   :  { %v1276_v29 = vpop.permute.xlu1 %1275 }
 0xc85   :  { %v1274_v30 = vpop.permute.xlu0 %1273  ;;  %v1296_v37 = vsel %vm285_vm1, %v5237_v18, %v1276_v29 }
 0xc86   :  { %v1295_v35 = vsel %vm285_vm1, %v5240_v19, %v1274_v30 }
 0xcec   :  { %v4515_v24 = vpop.f32.mrb[14].mxu1 }
 0xced   :  { %1283 = vrot.lane.b32.xlu1 %v4515_v24, %s5040_s26  ;;  %v1187_v25 = vpop.f32.mrb[15].mxu1 }
 0xcee   :  { %v4842_v26 = vpack.c.bf16 %v4515_v24, %v1187_v25  ;;  %1281 = vrot.lane.b32.xlu0 %v1187_v25, %s5040_s26 }
 0xcf0   :  { %4843 = vmatprep.subr.bf16.mxu0 %v4842_v26 }
 0xcf1   :  { %4845 = vmatpush3.bf16.msra.mxu0 %v4842_v26 }
 0xcf4   :  { %4521 = vmatmul.mubr.msk.f32.vlgmr.msra.gmra.mrb[12].mxu0 %vm29_vm0, %v5096_v4 }
 0xcf5   :  { %4534 = vmatprep.mubr.msk.f32.mxu0 %vm29_vm0, %v5085_v2 }
 0xd5f   :  { %v1284_v32 = vpop.permute.xlu1 %1283 }
 0xd60   :  { %v1282_v34 = vpop.permute.xlu0 %1281  ;;  %v1298_v40 = vsel %vm288_vm2, %v1296_v37, %v1284_v32 }
 0xd61   :  { %v1297_v38 = vsel %vm288_vm2, %v1295_v35, %v1282_v34 }
 0xdc7   :  { %v4522_v27 = vpop.f32.mrb[12].mxu0 }
 0xdc8   :  { %1291 = vrot.lane.b32.xlu1 %v4522_v27, %s5041_s6  ;;  %v1262_v28 = vpop.f32.mrb[13].mxu0 }
 0xdc9   :  { %1289 = vrot.lane.b32.xlu0 %v1262_v28, %s5041_s6 }
 0xe3a   :  { %v1292_v36 = vpop.permute.xlu1 %1291 }
 0xe3b   :  { %v1290_v39 = vpop.permute.xlu0 %1289  ;;  %v1300_v42 = vsel %vm291_vm3, %v1298_v40, %v1292_v36 }
 0xe3c   :  { %v1299_v41 = vsel %vm291_vm3, %v1297_v38, %v1290_v39 }
 0xe3d   :  { %4527 = vmatprep.mubr.msk.f32.mxu1 %vm29_vm0, %v1299_v41 }
 0xe3e   :  { %4528 = vmatmul.mubr.msk.f32.vlgmr.msra.gmra.mrb[16].mxu1 %vm29_vm0, %v1300_v42 }
 0xe3f   :  { %4857 = vmatpush3.bf16.msra.mxu1 %v5143_v31 }
 0xe40   :  { %4859 = vmatprep.subr.bf16.mxu1 %v5148_v33 }
 0xe43   :  { %4861 = vmatpush3.bf16.msra.mxu1 %v5148_v33 }
 0xf11   :  { %v4529_v43 = vpop.f32.mrb[16].mxu1 }
 0xf12   :  { %5013 = vtanh.f32 %v4529_v43  ;;  %v1373_v44 = vpop.f32.mrb[17].mxu1 }
 0xf13   :  { %5015 = vtanh.f32 %v1373_v44 }
 0xf1c   :  { %v5014_v45 = vpop.eup %5013 }
 0xf1d   :  { %v5016_v46 = vpop.eup %5015 }
 0xf1e   :  { %v4850_v47 = vpack.c.bf16 %v5014_v45, %v5016_v46 }
 0xf20   :  { %4851 = vmatprep.subr.bf16.mxu0 %v4850_v47 }
 0xf21   :  { %4853 = vmatpush3.bf16.msra.mxu0 %v4850_v47 }
 0xf24   :  { %4535 = vmatmul.mubr.msk.f32.vlgmr.msra.gmra.mrb[14].mxu0 %vm29_vm0, %v5096_v4 }
 0xf25   :  { %4552 = vmatprep.mubr.msk.f32.mxu0 %vm29_vm0, %v5085_v2 }
 0xff7   :  { %v4536_v48 = vpop.f32.mrb[14].mxu0 }
 0xff8   :  { %v1450_v49 = vpop.f32.mrb[15].mxu0 }
 0xff9   :  { %4545 = vmatprep.mubr.msk.f32.mxu1 %vm452_vm4, %v1450_v49 }
 0xffa   :  { %4546 = vmatmul.mubr.msk.f32.vlgmr.msra.gmra.mrb[18].mxu1 %vm452_vm4, %v4536_v48 }
 0xffb   :  { %4566 = vmatprep.mubr.msk.f32.mxu1 %vm29_vm0, %v5085_v2 }
0x10cd   :  { %v4547_v50 = vpop.f32.mrb[18].mxu1 }
0x10ce   :  { %v1541_v51 = vmul.f32 0.1, %v4547_v50  ;;  %4121 = vst.msk [vmem:[%s5640_s5 + $0x28] sm:$0xff] %vm285_vm1, %v4547_v50  ;;  %v1531_v52 = vpop.f32.mrb[19].mxu1 }
0x10cf   :  { %v1540_v53 = vmul.f32 0.1, %v1531_v52  ;;  %4120 = vst.msk [vmem:[%s5640_s5 + $0x20] sm:$0xff] %vm285_vm1, %v1531_v52 }
0x10d0   :  { %v5303_v54 = vadd.f32 %v1541_v51, %v5237_v18 }
0x10d1   :  { %v5306_v55 = vadd.f32 %v1540_v53, %v5240_v19 }
0x10d2   :  { %4119 = vst.msk [vmem:[%s5641_s4 + $0x28] sm:$0xff] %vm285_vm1, %v5303_v54 }
0x10d3   :  { %4118 = vst.msk [vmem:[%s5641_s4 + $0x20] sm:$0xff] %vm285_vm1, %v5306_v55  ;;  %v4862_v56 = vpack.c.bf16 %v5303_v54, %v5306_v55 }
0x10d5   :  { %4863 = vmatprep.subr.bf16.mxu0 %v4862_v56 }
0x10d6   :  { %4865 = vmatpush3.bf16.msra.mxu0 %v4862_v56 }
0x10d9   :  { %4553 = vmatmul.mubr.msk.f32.vlgmr.msra.gmra.mrb[16].mxu0 %vm29_vm0, %v5096_v4 }
0x10da   :  { %4559 = vmatprep.mubr.msk.f32.mxu0 %vm29_vm0, %v5085_v2 }
0x11ac   :  { %v4554_v57 = vpop.f32.mrb[16].mxu0 }
0x11ad   :  { %1779 = vrot.lane.b32.xlu1 %v4554_v57, %s5039_s0  ;;  %v1616_v58 = vpop.f32.mrb[17].mxu0 }
0x11ae   :  { %v4866_v59 = vpack.c.bf16 %v4554_v57, %v1616_v58  ;;  %1777 = vrot.lane.b32.xlu0 %v1616_v58, %s5039_s0 }
0x11b0   :  { %4867 = vmatprep.subr.bf16.mxu0 %v4866_v59 }
0x11b1   :  { %4869 = vmatpush3.bf16.msra.mxu0 %v4866_v59 }
0x11b2   :  { %4875 = vmatprep.subr.bf16.mxu0 %v5118_v13 }
0x11b4   :  { %4560 = vmatmul.mubr.msk.f32.vlgmr.msra.gmra.mrb[18].mxu0 %vm29_vm0, %v5096_v4 }
0x11b5   :  { %4877 = vmatpush3.bf16.msra.mxu0 %v5118_v13 }
0x11b6   :  { %4883 = vmatprep.subr.bf16.mxu0 %v5143_v31 }
0x121f   :  { %v1780_v1 = vpop.permute.xlu1 %1779 }
0x1220   :  { %v1778_v3 = vpop.permute.xlu0 %1777  ;;  %v1800_v9 = vsel %vm285_vm1, %v5303_v54, %v1780_v1 }
0x1221   :  { %v1799_v7 = vsel %vm285_vm1, %v5306_v55, %v1778_v3 }
0x1287   :  { %v4561_v60 = vpop.f32.mrb[18].mxu0 }
0x1288   :  { %1787 = vrot.lane.b32.xlu1 %v4561_v60, %s5040_s26  ;;  %v1691_v61 = vpop.f32.mrb[19].mxu0 }
0x1289   :  { %v4870_v62 = vpack.c.bf16 %v4561_v60, %v1691_v61  ;;  %1785 = vrot.lane.b32.xlu0 %v1691_v61, %s5040_s26 }
0x128b   :  { %4871 = vmatprep.subr.bf16.mxu1 %v4870_v62 }
0x128c   :  { %4873 = vmatpush3.bf16.msra.mxu1 %v4870_v62 }
0x128f   :  { %4567 = vmatmul.mubr.msk.f32.vlgmr.msra.gmra.mrb[20].mxu1 %vm29_vm0, %v5096_v4 }
0x1290   :  { %4580 = vmatprep.mubr.msk.f32.mxu1 %vm29_vm0, %v5085_v2 }
0x12fa   :  { %v1788_v5 = vpop.permute.xlu1 %1787 }
0x12fb   :  { %v1786_v6 = vpop.permute.xlu0 %1785  ;;  %v1802_v12 = vsel %vm288_vm2, %v1800_v9, %v1788_v5 }
0x12fc   :  { %v1801_v10 = vsel %vm288_vm2, %v1799_v7, %v1786_v6 }
0x1362   :  { %v4568_v63 = vpop.f32.mrb[20].mxu1 }
0x1363   :  { %1795 = vrot.lane.b32.xlu1 %v4568_v63, %s5041_s6  ;;  %v1766_v0 = vpop.f32.mrb[21].mxu1 }
0x1364   :  { %1793 = vrot.lane.b32.xlu0 %v1766_v0, %s5041_s6 }
0x13d5   :  { %v1796_v8 = vpop.permute.xlu1 %1795 }
0x13d6   :  { %v1794_v11 = vpop.permute.xlu0 %1793  ;;  %v1804_v15 = vsel %vm291_vm3, %v1802_v12, %v1796_v8 }
0x13d7   :  { %v1803_v14 = vsel %vm291_vm3, %v1801_v10, %v1794_v11 }
0x13d8   :  { %4573 = vmatprep.mubr.msk.f32.mxu0 %vm29_vm0, %v1803_v14 }
0x13d9   :  { %4574 = vmatmul.mubr.msk.f32.vlgmr.msra.gmra.mrb[20].mxu0 %vm29_vm0, %v1804_v15 }
0x13da   :  { %4885 = vmatpush3.bf16.msra.mxu0 %v5143_v31 }
0x13db   :  { %4887 = vmatprep.subr.bf16.mxu0 %v5148_v33 }
0x13de   :  { %4889 = vmatpush3.bf16.msra.mxu0 %v5148_v33 }
0x14ac   :  { %v4575_v16 = vpop.f32.mrb[20].mxu0 }
0x14ad   :  { %5017 = vtanh.f32 %v4575_v16  ;;  %v1877_v17 = vpop.f32.mrb[21].mxu0 }
0x14ae   :  { %5019 = vtanh.f32 %v1877_v17 }
0x14b7   :  { %v5018_v18 = vpop.eup %5017 }
0x14b8   :  { %v5020_v19 = vpop.eup %5019 }
0x14b9   :  { %v4878_v20 = vpack.c.bf16 %v5018_v18, %v5020_v19 }
0x14bb   :  { %4879 = vmatprep.subr.bf16.mxu1 %v4878_v20 }
0x14bc   :  { %4881 = vmatpush3.bf16.msra.mxu1 %v4878_v20 }
0x14bf   :  { %4581 = vmatmul.mubr.msk.f32.vlgmr.msra.gmra.mrb[22].mxu1 %vm29_vm0, %v5096_v4 }
0x14c0   :  { %4598 = vmatprep.mubr.msk.f32.mxu1 %vm29_vm0, %v5085_v2 }
0x1592   :  { %v4582_v21 = vpop.f32.mrb[22].mxu1 }
0x1593   :  { %v1954_v22 = vpop.f32.mrb[23].mxu1 }
0x1594   :  { %4591 = vmatprep.mubr.msk.f32.mxu0 %vm452_vm4, %v1954_v22 }
0x1595   :  { %4592 = vmatmul.mubr.msk.f32.vlgmr.msra.gmra.mrb[22].mxu0 %vm452_vm4, %v4582_v21 }
0x1596   :  { %4612 = vmatprep.mubr.msk.f32.mxu0 %vm29_vm0, %v5085_v2 }
0x1668   :  { %v4593_v23 = vpop.f32.mrb[22].mxu0 }
0x1669   :  { %v2045_v24 = vmul.f32 0.1, %v4593_v23  ;;  %4137 = vst.msk [vmem:[%s5640_s5 + $0x38] sm:$0xff] %vm285_vm1, %v4593_v23  ;;  %v2035_v25 = vpop.f32.mrb[23].mxu0 }
0x166a   :  { %v2044_v26 = vmul.f32 0.1, %v2035_v25  ;;  %4136 = vst.msk [vmem:[%s5640_s5 + $0x30] sm:$0xff] %vm285_vm1, %v2035_v25 }
0x166b   :  { %v5369_v27 = vadd.f32 %v2045_v24, %v5303_v54 }
0x166c   :  { %v5372_v28 = vadd.f32 %v2044_v26, %v5306_v55 }
0x166d   :  { %4135 = vst.msk [vmem:[%s5641_s4 + $0x38] sm:$0xff] %vm285_vm1, %v5369_v27 }
0x166e   :  { %4134 = vst.msk [vmem:[%s5641_s4 + $0x30] sm:$0xff] %vm285_vm1, %v5372_v28  ;;  %v4890_v29 = vpack.c.bf16 %v5369_v27, %v5372_v28 }
0x1670   :  { %4891 = vmatprep.subr.bf16.mxu1 %v4890_v29 }
0x1671   :  { %4893 = vmatpush3.bf16.msra.mxu1 %v4890_v29 }
0x1674   :  { %4599 = vmatmul.mubr.msk.f32.vlgmr.msra.gmra.mrb[24].mxu1 %vm29_vm0, %v5096_v4 }
0x1675   :  { %4605 = vmatprep.mubr.msk.f32.mxu1 %vm29_vm0, %v5085_v2 }
0x1747   :  { %v4600_v30 = vpop.f32.mrb[24].mxu1 }
0x1748   :  { %2283 = vrot.lane.b32.xlu1 %v4600_v30, %s5039_s0  ;;  %v2120_v32 = vpop.f32.mrb[25].mxu1 }
0x1749   :  { %v4894_v34 = vpack.c.bf16 %v4600_v30, %v2120_v32  ;;  %2281 = vrot.lane.b32.xlu0 %v2120_v32, %s5039_s0 }
0x174b   :  { %4895 = vmatprep.subr.bf16.mxu1 %v4894_v34 }
0x174c   :  { %4897 = vmatpush3.bf16.msra.mxu1 %v4894_v34 }
0x174d   :  { %4903 = vmatprep.subr.bf16.mxu1 %v5118_v13 }
0x174f   :  { %4606 = vmatmul.mubr.msk.f32.vlgmr.msra.gmra.mrb[26].mxu1 %vm29_vm0, %v5096_v4 }
0x1750   :  { %4905 = vmatpush3.bf16.msra.mxu1 %v5118_v13 }
0x1751   :  { %4911 = vmatprep.subr.bf16.mxu1 %v5143_v31 }
0x17ba   :  { %v2284_v40 = vpop.permute.xlu1 %2283 }
0x17bb   :  { %v2282_v41 = vpop.permute.xlu0 %2281  ;;  %v2304_v46 = vsel %vm285_vm1, %v5369_v27, %v2284_v40 }
0x17bc   :  { %v2303_v44 = vsel %vm285_vm1, %v5372_v28, %v2282_v41 }
0x1822   :  { %v4607_v35 = vpop.f32.mrb[26].mxu1 }
0x1823   :  { %2291 = vrot.lane.b32.xlu1 %v4607_v35, %s5040_s26  ;;  %v2195_v36 = vpop.f32.mrb[27].mxu1 }
0x1824   :  { %v4898_v37 = vpack.c.bf16 %v4607_v35, %v2195_v36  ;;  %2289 = vrot.lane.b32.xlu0 %v2195_v36, %s5040_s26 }
0x1826   :  { %4899 = vmatprep.subr.bf16.mxu0 %v4898_v37 }
0x1827   :  { %4901 = vmatpush3.bf16.msra.mxu0 %v4898_v37 }
0x182a   :  { %4613 = vmatmul.mubr.msk.f32.vlgmr.msra.gmra.mrb[24].mxu0 %vm29_vm0, %v5096_v4 }
0x182b   :  { %4626 = vmatprep.mubr.msk.f32.mxu0 %vm29_vm0, %v5085_v2 }
0x1895   :  { %v2292_v42 = vpop.permute.xlu1 %2291 }
0x1896   :  { %v2290_v43 = vpop.permute.xlu0 %2289  ;;  %v2306_v49 = vsel %vm288_vm2, %v2304_v46, %v2292_v42 }
0x1897   :  { %v2305_v47 = vsel %vm288_vm2, %v2303_v44, %v2290_v43 }
0x18fd   :  { %v4614_v38 = vpop.f32.mrb[24].mxu0 }
0x18fe   :  { %2299 = vrot.lane.b32.xlu1 %v4614_v38, %s5041_s6  ;;  %v2270_v39 = vpop.f32.mrb[25].mxu0 }
0x18ff   :  { %2297 = vrot.lane.b32.xlu0 %v2270_v39, %s5041_s6 }
0x1970   :  { %v2300_v45 = vpop.permute.xlu1 %2299 }
0x1971   :  { %v2298_v48 = vpop.permute.xlu0 %2297  ;;  %v2308_v51 = vsel %vm291_vm3, %v2306_v49, %v2300_v45 }
0x1972   :  { %v2307_v50 = vsel %vm291_vm3, %v2305_v47, %v2298_v48 }
0x1973   :  { %4619 = vmatprep.mubr.msk.f32.mxu1 %vm29_vm0, %v2307_v50 }
0x1974   :  { %4620 = vmatmul.mubr.msk.f32.vlgmr.msra.gmra.mrb[28].mxu1 %vm29_vm0, %v2308_v51 }
0x1975   :  { %4913 = vmatpush3.bf16.msra.mxu1 %v5143_v31 }
0x1976   :  { %4915 = vmatprep.subr.bf16.mxu1 %v5148_v33 }
0x1979   :  { %4917 = vmatpush3.bf16.msra.mxu1 %v5148_v33 }
0x1a47   :  { %v4621_v52 = vpop.f32.mrb[28].mxu1 }
0x1a48   :  { %5021 = vtanh.f32 %v4621_v52  ;;  %v2381_v53 = vpop.f32.mrb[29].mxu1 }
0x1a49   :  { %5023 = vtanh.f32 %v2381_v53 }
0x1a52   :  { %v5022_v54 = vpop.eup %5021 }
0x1a53   :  { %v5024_v55 = vpop.eup %5023 }
0x1a54   :  { %v4906_v56 = vpack.c.bf16 %v5022_v54, %v5024_v55 }
0x1a56   :  { %4907 = vmatprep.subr.bf16.mxu0 %v4906_v56 }
0x1a57   :  { %4909 = vmatpush3.bf16.msra.mxu0 %v4906_v56 }
0x1a5a   :  { %4627 = vmatmul.mubr.msk.f32.vlgmr.msra.gmra.mrb[26].mxu0 %vm29_vm0, %v5096_v4 }
0x1a5b   :  { %4644 = vmatprep.mubr.msk.f32.mxu0 %vm29_vm0, %v5085_v2 }
0x1b2d   :  { %v4628_v57 = vpop.f32.mrb[26].mxu0 }
0x1b2e   :  { %v2458_v58 = vpop.f32.mrb[27].mxu0 }
0x1b2f   :  { %4637 = vmatprep.mubr.msk.f32.mxu1 %vm452_vm4, %v2458_v58 }
0x1b30   :  { %4638 = vmatmul.mubr.msk.f32.vlgmr.msra.gmra.mrb[30].mxu1 %vm452_vm4, %v4628_v57 }
0x1b31   :  { %4658 = vmatprep.mubr.msk.f32.mxu1 %vm29_vm0, %v5085_v2 }
0x1c03   :  { %v4639_v59 = vpop.f32.mrb[30].mxu1 }
0x1c04   :  { %v2549_v60 = vmul.f32 0.1, %v4639_v59  ;;  %4153 = vst.msk [vmem:[%s5640_s5 + $0x48] sm:$0xff] %vm285_vm1, %v4639_v59  ;;  %v2539_v61 = vpop.f32.mrb[31].mxu1 }
0x1c05   :  { %v2548_v62 = vmul.f32 0.1, %v2539_v61  ;;  %4152 = vst.msk [vmem:[%s5640_s5 + $0x40] sm:$0xff] %vm285_vm1, %v2539_v61 }
0x1c06   :  { %v5435_v63 = vadd.f32 %v2549_v60, %v5369_v27 }
0x1c07   :  { %v5438_v0 = vadd.f32 %v2548_v62, %v5372_v28 }
0x1c08   :  { %4151 = vst.msk [vmem:[%s5641_s4 + $0x48] sm:$0xff] %vm285_vm1, %v5435_v63 }
0x1c09   :  { %4150 = vst.msk [vmem:[%s5641_s4 + $0x40] sm:$0xff] %vm285_vm1, %v5438_v0  ;;  %v4918_v1 = vpack.c.bf16 %v5435_v63, %v5438_v0 }
0x1c0b   :  { %4919 = vmatprep.subr.bf16.mxu0 %v4918_v1 }
0x1c0c   :  { %4921 = vmatpush3.bf16.msra.mxu0 %v4918_v1  ;;  %v5037_v1 = vld [vmem:[%s5637_s1] sm:$0xff] }
0x1c0f   :  { %4645 = vmatmul.mubr.msk.f32.vlgmr.msra.gmra.mrb[28].mxu0 %vm29_vm0, %v5096_v4 }
0x1c10   :  { %4651 = vmatprep.mubr.msk.f32.mxu0 %vm29_vm0, %v5085_v2 }
0x1ce2   :  { %v4646_v3 = vpop.f32.mrb[28].mxu0 }
0x1ce3   :  { %2787 = vrot.lane.b32.xlu1 %v4646_v3, %s5039_s0  ;;  %v2624_v5 = vpop.f32.mrb[29].mxu0 }
0x1ce4   :  { %v4922_v6 = vpack.c.bf16 %v4646_v3, %v2624_v5  ;;  %2785 = vrot.lane.b32.xlu0 %v2624_v5, %s5039_s0 }
0x1ce6   :  { %4923 = vmatprep.subr.bf16.mxu0 %v4922_v6 }
0x1ce7   :  { %4925 = vmatpush3.bf16.msra.mxu0 %v4922_v6 }
0x1ce8   :  { %4931 = vmatprep.subr.bf16.mxu0 %v5118_v13 }
0x1cea   :  { %4652 = vmatmul.mubr.msk.f32.vlgmr.msra.gmra.mrb[30].mxu0 %vm29_vm0, %v5096_v4 }
0x1ceb   :  { %4933 = vmatpush3.bf16.msra.mxu0 %v5118_v13 }
0x1cec   :  { %4939 = vmatprep.subr.bf16.mxu0 %v5143_v31 }
0x1d55   :  { %v2788_v12 = vpop.permute.xlu1 %2787 }
0x1d56   :  { %v2786_v14 = vpop.permute.xlu0 %2785  ;;  %v2808_v19 = vsel %vm285_vm1, %v5435_v63, %v2788_v12  ;;  %v5038_v12 = vld [vmem:[%s5637_s1 + $0x8] sm:$0xff] }
0x1d57   :  { %v2807_v17 = vsel %vm285_vm1, %v5438_v0, %v2786_v14 }
0x1dbd   :  { %v4653_v7 = vpop.f32.mrb[30].mxu0 }
0x1dbe   :  { %2795 = vrot.lane.b32.xlu1 %v4653_v7, %s5040_s26  ;;  %v2699_v8 = vpop.f32.mrb[31].mxu0 }
0x1dbf   :  { %v4926_v9 = vpack.c.bf16 %v4653_v7, %v2699_v8  ;;  %2793 = vrot.lane.b32.xlu0 %v2699_v8, %s5040_s26 }
0x1dc1   :  { %4927 = vmatprep.subr.bf16.mxu1 %v4926_v9 }
0x1dc2   :  { %4929 = vmatpush3.bf16.msra.mxu1 %v4926_v9 }
0x1dc5   :  { %4659 = vmatmul.mubr.msk.f32.vlgmr.msra.gmra.mrb[32].mxu1 %vm29_vm0, %v5096_v4 }
0x1dc6   :  { %4672 = vmatprep.mubr.msk.f32.mxu1 %vm29_vm0, %v5085_v2 }
0x1e30   :  { %v2796_v15 = vpop.permute.xlu1 %2795 }
0x1e31   :  { %v2794_v16 = vpop.permute.xlu0 %2793  ;;  %v2810_v22 = vsel %vm288_vm2, %v2808_v19, %v2796_v15 }
0x1e32   :  { %v2809_v20 = vsel %vm288_vm2, %v2807_v17, %v2794_v16 }
0x1e98   :  { %v4660_v10 = vpop.f32.mrb[32].mxu1 }
0x1e99   :  { %2803 = vrot.lane.b32.xlu1 %v4660_v10, %s5041_s6  ;;  %v2774_v11 = vpop.f32.mrb[33].mxu1 }
0x1e9a   :  { %2801 = vrot.lane.b32.xlu0 %v2774_v11, %s5041_s6 }
0x1f0b   :  { %v2804_v18 = vpop.permute.xlu1 %2803 }
0x1f0c   :  { %v2802_v21 = vpop.permute.xlu0 %2801  ;;  %v2812_v24 = vsel %vm291_vm3, %v2810_v22, %v2804_v18 }
0x1f0d   :  { %v2811_v23 = vsel %vm291_vm3, %v2809_v20, %v2802_v21 }
0x1f0e   :  { %4665 = vmatprep.mubr.msk.f32.mxu0 %vm29_vm0, %v2811_v23 }
0x1f0f   :  { %4666 = vmatmul.mubr.msk.f32.vlgmr.msra.gmra.mrb[32].mxu0 %vm29_vm0, %v2812_v24 }
0x1f10   :  { %4941 = vmatpush3.bf16.msra.mxu0 %v5143_v31 }
0x1f11   :  { %4943 = vmatprep.subr.bf16.mxu0 %v5148_v33 }
0x1f14   :  { %4945 = vmatpush3.bf16.msra.mxu0 %v5148_v33 }
0x1fe2   :  { %v4667_v25 = vpop.f32.mrb[32].mxu0 }
0x1fe3   :  { %5025 = vtanh.f32 %v4667_v25  ;;  %v2885_v26 = vpop.f32.mrb[33].mxu0 }
0x1fe4   :  { %5027 = vtanh.f32 %v2885_v26 }
0x1fed   :  { %v5026_v27 = vpop.eup %5025 }
0x1fee   :  { %v5028_v28 = vpop.eup %5027 }
0x1fef   :  { %v4934_v29 = vpack.c.bf16 %v5026_v27, %v5028_v28 }
0x1ff1   :  { %4935 = vmatprep.subr.bf16.mxu1 %v4934_v29 }
0x1ff2   :  { %4937 = vmatpush3.bf16.msra.mxu1 %v4934_v29 }
0x1ff5   :  { %4673 = vmatmul.mubr.msk.f32.vlgmr.msra.gmra.mrb[34].mxu1 %vm29_vm0, %v5096_v4 }
0x1ff6   :  { %4690 = vmatprep.mubr.msk.f32.mxu1 %vm29_vm0, %v5085_v2 }
0x20c8   :  { %v4674_v30 = vpop.f32.mrb[34].mxu1 }
0x20c9   :  { %v2962_v32 = vpop.f32.mrb[35].mxu1 }
0x20ca   :  { %4683 = vmatprep.mubr.msk.f32.mxu0 %vm452_vm4, %v2962_v32 }
0x20cb   :  { %4684 = vmatmul.mubr.msk.f32.vlgmr.msra.gmra.mrb[34].mxu0 %vm452_vm4, %v4674_v30 }
0x20cc   :  { %4704 = vmatprep.mubr.msk.f32.mxu0 %vm29_vm0, %v5085_v2 }
0x219e   :  { %v4685_v34 = vpop.f32.mrb[34].mxu0 }
0x219f   :  { %v3053_v35 = vmul.f32 0.1, %v4685_v34  ;;  %4169 = vst.msk [vmem:[%s5640_s5 + $0x58] sm:$0xff] %vm285_vm1, %v4685_v34  ;;  %v3043_v36 = vpop.f32.mrb[35].mxu0 }
0x21a0   :  { %v3052_v37 = vmul.f32 0.1, %v3043_v36  ;;  %4168 = vst.msk [vmem:[%s5640_s5 + $0x50] sm:$0xff] %vm285_vm1, %v3043_v36 }
0x21a1   :  { %v5501_v38 = vadd.f32 %v3053_v35, %v5435_v63 }
0x21a2   :  { %v5504_v39 = vadd.f32 %v3052_v37, %v5438_v0 }
0x21a3   :  { %4167 = vst.msk [vmem:[%s5641_s4 + $0x58] sm:$0xff] %vm285_vm1, %v5501_v38 }
0x21a4   :  { %4166 = vst.msk [vmem:[%s5641_s4 + $0x50] sm:$0xff] %vm285_vm1, %v5504_v39  ;;  %v4946_v40 = vpack.c.bf16 %v5501_v38, %v5504_v39 }
0x21a6   :  { %4947 = vmatprep.subr.bf16.mxu1 %v4946_v40 }
0x21a7   :  { %4949 = vmatpush3.bf16.msra.mxu1 %v4946_v40 }
0x21aa   :  { %4691 = vmatmul.mubr.msk.f32.vlgmr.msra.gmra.mrb[36].mxu1 %vm29_vm0, %v5096_v4 }
0x21ab   :  { %4697 = vmatprep.mubr.msk.f32.mxu1 %vm29_vm0, %v5085_v2 }
0x227d   :  { %v4692_v41 = vpop.f32.mrb[36].mxu1 }
0x227e   :  { %3291 = vrot.lane.b32.xlu1 %v4692_v41, %s5039_s0  ;;  %v3128_v42 = vpop.f32.mrb[37].mxu1 }
0x227f   :  { %v4950_v43 = vpack.c.bf16 %v4692_v41, %v3128_v42  ;;  %3289 = vrot.lane.b32.xlu0 %v3128_v42, %s5039_s0 }
0x2281   :  { %4951 = vmatprep.subr.bf16.mxu1 %v4950_v43 }
0x2282   :  { %4953 = vmatpush3.bf16.msra.mxu1 %v4950_v43 }
0x2283   :  { %4959 = vmatprep.subr.bf16.mxu1 %v5118_v13 }
0x2285   :  { %4698 = vmatmul.mubr.msk.f32.vlgmr.msra.gmra.mrb[38].mxu1 %vm29_vm0, %v5096_v4 }
0x2286   :  { %4961 = vmatpush3.bf16.msra.mxu1 %v5118_v13 }
0x2287   :  { %4967 = vmatprep.subr.bf16.mxu1 %v5143_v31 }
0x22f0   :  { %v3292_v49 = vpop.permute.xlu1 %3291 }
0x22f1   :  { %v3290_v50 = vpop.permute.xlu0 %3289  ;;  %v3312_v55 = vsel %vm285_vm1, %v5501_v38, %v3292_v49 }
0x22f2   :  { %v3311_v53 = vsel %vm285_vm1, %v5504_v39, %v3290_v50 }
0x2358   :  { %v4699_v44 = vpop.f32.mrb[38].mxu1 }
0x2359   :  { %3299 = vrot.lane.b32.xlu1 %v4699_v44, %s5040_s26  ;;  %v3203_v45 = vpop.f32.mrb[39].mxu1 }
0x235a   :  { %v4954_v46 = vpack.c.bf16 %v4699_v44, %v3203_v45  ;;  %3297 = vrot.lane.b32.xlu0 %v3203_v45, %s5040_s26 }
0x235c   :  { %4955 = vmatprep.subr.bf16.mxu0 %v4954_v46 }
0x235d   :  { %4957 = vmatpush3.bf16.msra.mxu0 %v4954_v46 }
0x2360   :  { %4705 = vmatmul.mubr.msk.f32.vlgmr.msra.gmra.mrb[36].mxu0 %vm29_vm0, %v5096_v4 }
0x2361   :  { %4718 = vmatprep.mubr.msk.f32.mxu0 %vm29_vm0, %v5085_v2 }
0x23cb   :  { %v3300_v51 = vpop.permute.xlu1 %3299 }
0x23cc   :  { %v3298_v52 = vpop.permute.xlu0 %3297  ;;  %v3314_v57 = vsel %vm288_vm2, %v3312_v55, %v3300_v51 }
0x23cd   :  { %v3313_v56 = vsel %vm288_vm2, %v3311_v53, %v3298_v52 }
0x2433   :  { %v4706_v47 = vpop.f32.mrb[36].mxu0 }
0x2434   :  { %3307 = vrot.lane.b32.xlu1 %v4706_v47, %s5041_s6  ;;  %v3278_v48 = vpop.f32.mrb[37].mxu0 }
0x2435   :  { %3305 = vrot.lane.b32.xlu0 %v3278_v48, %s5041_s6 }
0x24a6   :  { %v3308_v54 = vpop.permute.xlu1 %3307 }
0x24a7   :  { %v3306_v2 = vpop.permute.xlu0 %3305  ;;  %v3316_v59 = vsel %vm291_vm3, %v3314_v57, %v3308_v54 }
0x24a8   :  { %v3315_v58 = vsel %vm291_vm3, %v3313_v56, %v3306_v2 }
0x24a9   :  { %4711 = vmatprep.mubr.msk.f32.mxu1 %vm29_vm0, %v3315_v58 }
0x24aa   :  { %4712 = vmatmul.mubr.msk.f32.vlgmr.msra.gmra.mrb[40].mxu1 %vm29_vm0, %v3316_v59 }
0x24ab   :  { %4969 = vmatpush3.bf16.msra.mxu1 %v5143_v31 }
0x24ac   :  { %4971 = vmatprep.subr.bf16.mxu1 %v5148_v33 }
0x24af   :  { %4973 = vmatpush3.bf16.msra.mxu1 %v5148_v33 }
0x257d   :  { %v4713_v60 = vpop.f32.mrb[40].mxu1 }
0x257e   :  { %5029 = vtanh.f32 %v4713_v60  ;;  %v3389_v61 = vpop.f32.mrb[41].mxu1 }
0x257f   :  { %5031 = vtanh.f32 %v3389_v61 }
0x2588   :  { %v5030_v62 = vpop.eup %5029 }
0x2589   :  { %v5032_v63 = vpop.eup %5031 }
0x258a   :  { %v4962_v0 = vpack.c.bf16 %v5030_v62, %v5032_v63 }
0x258c   :  { %4963 = vmatprep.subr.bf16.mxu0 %v4962_v0 }
0x258d   :  { %4965 = vmatpush3.bf16.msra.mxu0 %v4962_v0 }
0x2590   :  { %4719 = vmatmul.mubr.msk.f32.vlgmr.msra.gmra.mrb[38].mxu0 %vm29_vm0, %v5096_v4 }
0x2591   :  { %4736 = vmatprep.mubr.msk.f32.mxu0 %vm29_vm0, %v5037_v1 }
0x2663   :  { %v4720_v3 = vpop.f32.mrb[38].mxu0 }
0x2664   :  { %v3466_v5 = vpop.f32.mrb[39].mxu0 }
0x2665   :  { %4729 = vmatprep.mubr.msk.f32.mxu1 %vm452_vm4, %v3466_v5 }
0x2666   :  { %4730 = vmatmul.mubr.msk.f32.vlgmr.msra.gmra.mrb[42].mxu1 %vm452_vm4, %v4720_v3 }
0x2667   :  { %4750 = vmatprep.mubr.msk.f32.mxu1 %vm29_vm0, %v5037_v1 }
0x2739   :  { %v4731_v6 = vpop.f32.mrb[42].mxu1 }
0x273a   :  { %v3557_v7 = vmul.f32 0.1, %v4731_v6  ;;  %4185 = vst.msk [vmem:[%s5640_s5 + $0x68] sm:$0xff] %vm285_vm1, %v4731_v6  ;;  %v3547_v4 = vpop.f32.mrb[43].mxu1 }
0x273b   :  { %v3556_v8 = vmul.f32 0.1, %v3547_v4  ;;  %4184 = vst.msk [vmem:[%s5640_s5 + $0x60] sm:$0xff] %vm285_vm1, %v3547_v4 }
0x273c   :  { %v5568_v9 = vadd.f32 %v3557_v7, %v5501_v38 }
0x273d   :  { %v5571_v10 = vadd.f32 %v3556_v8, %v5504_v39 }
0x273e   :  { %4183 = vst.msk [vmem:[%s5641_s4 + $0x68] sm:$0xff] %vm285_vm1, %v5568_v9 }
0x273f   :  { %4182 = vst.msk [vmem:[%s5641_s4 + $0x60] sm:$0xff] %vm285_vm1, %v5571_v10  ;;  %v4974_v11 = vpack.c.bf16 %v5568_v9, %v5571_v10 }
0x2741   :  { %4975 = vmatprep.subr.bf16.mxu0 %v4974_v11 }
0x2742   :  { %4977 = vmatpush3.bf16.msra.mxu0 %v4974_v11 }
0x2745   :  { %4737 = vmatmul.mubr.msk.f32.vlgmr.msra.gmra.mrb[40].mxu0 %vm29_vm0, %v5038_v12 }
0x2746   :  { %4743 = vmatprep.mubr.msk.f32.mxu0 %vm29_vm0, %v5037_v1 }
0x2818   :  { %v4738_v14 = vpop.f32.mrb[40].mxu0 }
0x2819   :  { %3795 = vrot.lane.b32.xlu1 %v4738_v14, %s5039_s0  ;;  %v3632_v15 = vpop.f32.mrb[41].mxu0 }
0x281a   :  { %v4978_v16 = vpack.c.bf16 %v4738_v14, %v3632_v15  ;;  %3793 = vrot.lane.b32.xlu0 %v3632_v15, %s5039_s0 }
0x281c   :  { %4979 = vmatprep.subr.bf16.mxu0 %v4978_v16 }
0x281d   :  { %4981 = vmatpush3.bf16.msra.mxu0 %v4978_v16 }
0x281e   :  { %4987 = vmatprep.subr.bf16.mxu0 %v5118_v13 }
0x2820   :  { %4744 = vmatmul.mubr.msk.f32.vlgmr.msra.gmra.mrb[42].mxu0 %vm29_vm0, %v5038_v12 }
0x2821   :  { %4989 = vmatpush3.bf16.msra.mxu0 %v5118_v13 }
0x2822   :  { %4995 = vmatprep.subr.bf16.mxu0 %v5143_v31 }
0x288b   :  { %v3796_v13 = vpop.permute.xlu1 %3795 }
0x288c   :  { %v3794_v22 = vpop.permute.xlu0 %3793  ;;  %v3816_v27 = vsel %vm285_vm1, %v5568_v9, %v3796_v13 }
0x288d   :  { %v3815_v25 = vsel %vm285_vm1, %v5571_v10, %v3794_v22 }
0x28f3   :  { %v4745_v17 = vpop.f32.mrb[42].mxu0 }
0x28f4   :  { %3803 = vrot.lane.b32.xlu1 %v4745_v17, %s5040_s26  ;;  %v3707_v18 = vpop.f32.mrb[43].mxu0 }
0x28f5   :  { %v4982_v19 = vpack.c.bf16 %v4745_v17, %v3707_v18  ;;  %3801 = vrot.lane.b32.xlu0 %v3707_v18, %s5040_s26 }
0x28f7   :  { %4983 = vmatprep.subr.bf16.mxu1 %v4982_v19 }
0x28f8   :  { %4985 = vmatpush3.bf16.msra.mxu1 %v4982_v19 }
0x28fb   :  { %4751 = vmatmul.mubr.msk.f32.vlgmr.msra.gmra.mrb[44].mxu1 %vm29_vm0, %v5038_v12 }
0x28fc   :  { %4764 = vmatprep.mubr.msk.f32.mxu1 %vm29_vm0, %v5037_v1 }
0x2966   :  { %v3804_v23 = vpop.permute.xlu1 %3803 }
0x2967   :  { %v3802_v24 = vpop.permute.xlu0 %3801  ;;  %v3818_v30 = vsel %vm288_vm2, %v3816_v27, %v3804_v23 }
0x2968   :  { %v3817_v28 = vsel %vm288_vm2, %v3815_v25, %v3802_v24 }
0x29ce   :  { %v4752_v20 = vpop.f32.mrb[44].mxu1 }
0x29cf   :  { %3811 = vrot.lane.b32.xlu1 %v4752_v20, %s5041_s6  ;;  %v3782_v21 = vpop.f32.mrb[45].mxu1 }
0x29d0   :  { %3809 = vrot.lane.b32.xlu0 %v3782_v21, %s5041_s6 }
0x2a41   :  { %v3812_v26 = vpop.permute.xlu1 %3811 }
0x2a42   :  { %v3810_v29 = vpop.permute.xlu0 %3809  ;;  %v3820_v34 = vsel %vm291_vm3, %v3818_v30, %v3812_v26 }
0x2a43   :  { %v3819_v32 = vsel %vm291_vm3, %v3817_v28, %v3810_v29 }
0x2a44   :  { %4757 = vmatprep.mubr.msk.f32.mxu0 %vm29_vm0, %v3819_v32 }
0x2a45   :  { %4758 = vmatmul.mubr.msk.f32.vlgmr.msra.gmra.mrb[44].mxu0 %vm29_vm0, %v3820_v34 }
0x2a46   :  { %4997 = vmatpush3.bf16.msra.mxu0 %v5143_v31 }
0x2a47   :  { %4999 = vmatprep.subr.bf16.mxu0 %v5148_v33 }
0x2a4a   :  { %5001 = vmatpush3.bf16.msra.mxu0 %v5148_v33 }
0x2b18   :  { %v4759_v35 = vpop.f32.mrb[44].mxu0 }
0x2b19   :  { %5033 = vtanh.f32 %v4759_v35  ;;  %v3893_v36 = vpop.f32.mrb[45].mxu0 }
0x2b1a   :  { %5035 = vtanh.f32 %v3893_v36 }
0x2b23   :  { %v5034_v37 = vpop.eup %5033 }
0x2b24   :  { %v5036_v38 = vpop.eup %5035 }
0x2b25   :  { %v4990_v39 = vpack.c.bf16 %v5034_v37, %v5036_v38 }
0x2b27   :  { %4991 = vmatprep.subr.bf16.mxu1 %v4990_v39 }
0x2b28   :  { %4993 = vmatpush3.bf16.msra.mxu1 %v4990_v39 }
0x2b2b   :  { %4765 = vmatmul.mubr.msk.f32.vlgmr.msra.gmra.mrb[46].mxu1 %vm29_vm0, %v5038_v12 }
0x2bfe   :  { %v4766_v40 = vpop.f32.mrb[46].mxu1 }
0x2bff   :  { %v3970_v41 = vpop.f32.mrb[47].mxu1 }
0x2c00   :  { %4775 = vmatprep.mubr.msk.f32.mxu0 %vm452_vm4, %v3970_v41 }
0x2c01   :  { %4776 = vmatmul.mubr.msk.f32.vlgmr.msra.gmra.mrb[46].mxu0 %vm452_vm4, %v4766_v40 }
0x2cd4   :  { %v4777_v31 = vpop.f32.mrb[46].mxu0 }
0x2cd5   :  { %v4061_v42 = vmul.f32 0.1, %v4777_v31  ;;  %4201 = vst.msk [vmem:[%s5640_s5 + $0x78] sm:$0xff] %vm285_vm1, %v4777_v31  ;;  %v4051_v33 = vpop.f32.mrb[47].mxu0 }
0x2cd6   :  { %v4060_v43 = vmul.f32 0.1, %v4051_v33  ;;  %4200 = vst.msk [vmem:[%s5640_s5 + $0x70] sm:$0xff] %vm285_vm1, %v4051_v33 }
0x2cd7   :  { %v4063_v44 = vadd.f32 %v4061_v42, %v5568_v9 }
0x2cd8   :  { %v4062_v45 = vadd.f32 %v4060_v43, %v5571_v10 }
0x2cd9   :  { %4199 = vst.msk [vmem:[%s5641_s4 + $0x78] sm:$0xff] %vm285_vm1, %v4063_v44 }
0x2cda   :  { %4198 = vst.msk [vmem:[%s5641_s4 + $0x70] sm:$0xff] %vm285_vm1, %v4062_v45 }

</bundles_post_ra>
